<compile_context>
chip_gen: v6e
topology: v6e:2x2x1
jax: 0.10.0
libtpu: 0.0.40
codegen_flags: <defaults>
</compile_context>

<pallas_src>
import functools

import jax
import jax.numpy as jnp
from jax.experimental import pallas as pl
from jax.experimental.pallas import tpu as pltpu


# ----------------------------------------------------------------------------
# Generation-aware configuration (VMEM budget, megacore, tile sizes).
# ----------------------------------------------------------------------------
def _vmem_capacity_bytes():
    try:
        info = pltpu.get_tpu_info()
        cap = getattr(info, "vmem_capacity_bytes", None)
        if cap:
            return int(cap)
    except Exception:
        pass
    return 128 * 1024 * 1024


def _num_tensorcores_per_chip():
    try:
        kind = jax.devices()[0].device_kind.lower().replace(" ", "")
    except Exception:
        return 1
    # v7x exposes 2 TensorCores per chip; earlier generations one.
    return 2 if ("v7" in kind or "tpu7" in kind) else 1


_VMEM_CAPACITY = _vmem_capacity_bytes()
# ~25% headroom for compiler scratch: ≈96 MiB on v5e/v6e, ≈48 MiB on v7x.
_VMEM_LIMIT = min((_VMEM_CAPACITY * 3) // 4, 100 * 1024 * 1024)
_BIG_VMEM = _VMEM_LIMIT >= 96 * 1024 * 1024
_NUM_CORES = _num_tensorcores_per_chip()

# 256/512-multiple tiles keep the 2x256^2 MXU full; bigger M tiles cut W_out
# re-streaming where VMEM allows it.
_MATMUL_TM = 512 if _BIG_VMEM else 256
_MATMUL_TN = 512


def _round_up(x, m):
    return ((x + m - 1) // m) * m


def _tile_and_pad(dim, pref):
    """Return (tile, padded_dim). Small dims use one full block; large dims are
    padded up to a multiple of the preferred tile (cdiv-style grid)."""
    if dim <= pref:
        return dim, dim
    return pref, _round_up(dim, pref)


def _batch_tile(B):
    # Split the batch only on v7x (2 TensorCores) so the "parallel" grid axis
    # can be sharded; on single-TC chips splitting just shrinks the per-step
    # MXU matmul and doubles grid overhead on the serial recurrence.
    if _NUM_CORES >= 2 and B % 2 == 0 and (B // 2) % 8 == 0:
        return B // 2
    return B


def _time_chunk(S):
    # Chunk the serial time axis to amortize per-grid-step overhead; chunks are
    # multiples of 8 so the (bt, tc, H) hidden-state store stays sublane
    # aligned, and kept smaller under v7x's 64 MiB VMEM.
    prefs = (32, 16, 8) if _BIG_VMEM else (16, 8)
    for c in prefs:
        if S > c and S % c == 0:
            return c
    return S


# ----------------------------------------------------------------------------
# Pallas kernels
# ----------------------------------------------------------------------------
def matmul_bias_kernel(x_ref, w_ref, b_ref, o_ref):
    """One (tm, K) x (K, tn) tile of a big batched projection (f32 accum)."""
    acc = jnp.dot(x_ref[...], w_ref[...], preferred_element_type=jnp.float32)
    o_ref[...] = (acc + b_ref[...]).astype(o_ref.dtype)


def _gru_step(gi, gh, h):
    """PyTorch-convention GRU gating (gate order [r, z, n]; b_hn inside r*(.)).
    All arguments f32; returns f32 new hidden state."""
    H = h.shape[-1]
    r = jax.nn.sigmoid(gi[:, :H] + gh[:, :H])
    z = jax.nn.sigmoid(gi[:, H:2 * H] + gh[:, H:2 * H])
    n = jnp.tanh(gi[:, 2 * H:] + r * gh[:, 2 * H:])
    return (1.0 - z) * n + z * h


def encoder_recurrent_kernel(gi_ref, w_hh_ref, b_hh_ref,
                             h_final_ref, h_scratch, *, t_chunk):
    c = pl.program_id(1)  # time-chunk axis ("arbitrary")

    @pl.when(c == 0)
    def _():
        h_scratch[...] = jnp.zeros_like(h_scratch)

    w_hh = w_hh_ref[...]                                       # bf16 (H, 3H)
    bt = h_scratch.shape[0]
    G = w_hh.shape[-1]
    # Hoisted bias broadcast (JAX does not CSE broadcast_in_dim per step).
    b_hh = jnp.broadcast_to(b_hh_ref[...], (bt, G))

    h = h_scratch[...]                                         # f32 (bt, H)
    for t in range(t_chunk):                                   # static unroll
        gi = gi_ref[t].astype(jnp.float32)
        gh = jnp.dot(h.astype(jnp.bfloat16), w_hh,
                     preferred_element_type=jnp.float32) + b_hh
        h = _gru_step(gi, gh, h)
    h_scratch[...] = h

    @pl.when(c == pl.num_programs(1) - 1)
    def _():
        h_final_ref[...] = h


def decoder_recurrent_kernel(gi_ref, ctx_ref, w_ctx_ref, w_hh_ref, b_hh_ref,
                             h_seq_ref, h_final_ref,
                             h_scratch, ctx_gi_scratch, *, t_chunk):
    c = pl.program_id(1)  # time-chunk axis ("arbitrary")

    @pl.when(c == 0)
    def _():
        ctx = ctx_ref[...]                                     # f32 (bt, H)
        h_scratch[...] = ctx                                   # init_state
        # Loop-invariant context projection, computed once per batch tile.
        ctx_gi_scratch[...] = jnp.dot(ctx.astype(jnp.bfloat16), w_ctx_ref[...],
                                      preferred_element_type=jnp.float32)

    w_hh = w_hh_ref[...]                                       # bf16 (H, 3H)
    ctx_gi = ctx_gi_scratch[...]                               # f32 (bt, 3H)
    b_hh = jnp.broadcast_to(b_hh_ref[...], ctx_gi.shape)       # hoisted

    h = h_scratch[...]                                         # f32 (bt, H)
    for t in range(t_chunk):                                   # static unroll
        gi = gi_ref[t].astype(jnp.float32) + ctx_gi
        gh = jnp.dot(h.astype(jnp.bfloat16), w_hh,
                     preferred_element_type=jnp.float32) + b_hh
        h = _gru_step(gi, gh, h)
        # Batch-major store: h_seq lands directly in (B, S, H), so the vocab
        # projection needs no transpose / extra HBM round trip.
        h_seq_ref[:, t, :] = h.astype(h_seq_ref.dtype)
    h_scratch[...] = h

    @pl.when(c == pl.num_programs(1) - 1)
    def _():
        h_final_ref[...] = h


# ----------------------------------------------------------------------------
# Wrappers (pallas_call plumbing)
# ----------------------------------------------------------------------------
def matmul_bias(x, w, b, out_dtype=jnp.float32):
    """Tiled (M,K)x(K,N)+b projection. M/N tiled (padded to tile multiples),
    K resident. x/w expected bf16 for MXU throughput; accumulation is f32."""
    M, K = x.shape
    N = w.shape[1]
    tm, Mp = _tile_and_pad(M, _MATMUL_TM)
    tn, Np = _tile_and_pad(N, _MATMUL_TN)
    if Mp != M:
        x = jnp.pad(x, ((0, Mp - M), (0, 0)))
    if Np != N:
        w = jnp.pad(w, ((0, 0), (0, Np - N)))
        b = jnp.pad(b, ((0, 0), (0, Np - N)))
    out = pl.pallas_call(
        matmul_bias_kernel,
        out_shape=jax.ShapeDtypeStruct((Mp, Np), out_dtype),
        grid_spec=pltpu.PrefetchScalarGridSpec(
            num_scalar_prefetch=0,
            grid=(Mp // tm, Np // tn),
            in_specs=[
                pl.BlockSpec((tm, K), lambda i, j: (i, 0)),
                pl.BlockSpec((K, tn), lambda i, j: (0, j)),
                pl.BlockSpec((1, tn), lambda i, j: (0, j)),
            ],
            out_specs=pl.BlockSpec((tm, tn), lambda i, j: (i, j)),
        ),
        compiler_params=pltpu.CompilerParams(
            dimension_semantics=("parallel", "parallel"),
            vmem_limit_bytes=_VMEM_LIMIT),
    )(x, w, b)
    if Mp != M or Np != N:
        out = out[:M, :N]
    return out


def run_encoder_recurrence(gi, w_hh, b_hh):
    """gi: (S, B, 3H) bf16 time-major precomputed input projection.
    Returns encoder final hidden (B, H) f32."""
    S, B, G = gi.shape
    H = w_hh.shape[0]
    bt = _batch_tile(B)
    tc = _time_chunk(S)
    kernel = functools.partial(encoder_recurrent_kernel, t_chunk=tc)
    return pl.pallas_call(
        kernel,
        out_shape=jax.ShapeDtypeStruct((B, H), jnp.float32),
        grid_spec=pltpu.PrefetchScalarGridSpec(
            num_scalar_prefetch=0,
            grid=(B // bt, S // tc),
            in_specs=[
                pl.BlockSpec((tc, bt, G), lambda b, c: (c, b, 0)),
                pl.BlockSpec((H, G), lambda b, c: (0, 0)),
                pl.BlockSpec((1, G), lambda b, c: (0, 0)),
            ],
            out_specs=pl.BlockSpec((bt, H), lambda b, c: (b, 0)),
            scratch_shapes=[pltpu.VMEM((bt, H), jnp.float32)],
        ),
        compiler_params=pltpu.CompilerParams(
            dimension_semantics=("parallel", "arbitrary"),
            vmem_limit_bytes=_VMEM_LIMIT),
    )(gi, w_hh, b_hh)


def run_decoder_recurrence(gi, context, w_ctx, w_hh, b_hh):
    """gi: (S, B, 3H) bf16 precomputed x-projection; context: (B, H) f32.
    Returns (h_seq (B, S, H) bf16, h_final (B, H) f32)."""
    S, B, G = gi.shape
    H = context.shape[-1]
    bt = _batch_tile(B)
    tc = _time_chunk(S)
    kernel = functools.partial(decoder_recurrent_kernel, t_chunk=tc)
    return pl.pallas_call(
        kernel,
        out_shape=(jax.ShapeDtypeStruct((B, S, H), jnp.bfloat16),
                   jax.ShapeDtypeStruct((B, H), jnp.float32)),
        grid_spec=pltpu.PrefetchScalarGridSpec(
            num_scalar_prefetch=0,
            grid=(B // bt, S // tc),
            in_specs=[
                pl.BlockSpec((tc, bt, G), lambda b, c: (c, b, 0)),
                pl.BlockSpec((bt, H), lambda b, c: (b, 0)),
                pl.BlockSpec((H, G), lambda b, c: (0, 0)),
                pl.BlockSpec((H, G), lambda b, c: (0, 0)),
                pl.BlockSpec((1, G), lambda b, c: (0, 0)),
            ],
            out_specs=[
                pl.BlockSpec((bt, tc, H), lambda b, c: (b, c, 0)),
                pl.BlockSpec((bt, H), lambda b, c: (b, 0)),
            ],
            scratch_shapes=[pltpu.VMEM((bt, H), jnp.float32),
                            pltpu.VMEM((bt, G), jnp.float32)],
        ),
        compiler_params=pltpu.CompilerParams(
            dimension_semantics=("parallel", "arbitrary"),
            vmem_limit_bytes=_VMEM_LIMIT),
    )(gi, context, w_ctx, w_hh, b_hh)


@jax.jit
def encoder_decoder_forward(enc_X, dec_X, params):
    """EncoderDecoder.forward(enc_X, dec_X).

    enc_X, dec_X: (batch, seq) int32 token ids.
    Returns (dec_output (batch, seq, vocab) f32, dec_state (1, batch, hidden) f32).
    """
    H = params["enc_w_hh"].shape[0]
    V = params["dec_w_out"].shape[-1]
    bf16 = jnp.bfloat16

    # Embedding gathers straight into time-major layout (transpose the tiny
    # int token matrix, not the embedded activations); stream as bf16.
    enc_emb = jnp.take(params["enc_emb"], enc_X.T, axis=0).astype(bf16)
    dec_emb = jnp.take(params["dec_emb"], dec_X.T, axis=0).astype(bf16)
    Se, B, E = enc_emb.shape
    Sd = dec_emb.shape[0]

    # ---- Encoder: batched bf16 input projection, then thin recurrence ----
    enc_gi = matmul_bias(enc_emb.reshape(Se * B, E),
                         params["enc_w_ih"].astype(bf16),
                         params["enc_b_ih"], out_dtype=bf16)
    enc_state = run_encoder_recurrence(enc_gi.reshape(Se, B, 3 * H),
                                       params["enc_w_hh"].astype(bf16),
                                       params["enc_b_hh"])

    # ---- Decoder: batched x-projection, recurrence with hoisted ctx proj ----
    dec_gi = matmul_bias(dec_emb.reshape(Sd * B, E),
                         params["dec_w_x"].astype(bf16),
                         params["dec_b_ih"], out_dtype=bf16)
    h_seq, dec_state = run_decoder_recurrence(
        dec_gi.reshape(Sd, B, 3 * H), enc_state,
        params["dec_w_ctx"].astype(bf16),
        params["dec_w_hh"].astype(bf16),
        params["dec_b_hh"])

    # ---- Vocab projection off the serial path (lane-dense tiled matmul) ----
    # h_seq is already (B, S, H): the reshape below is a free view.
    logits = matmul_bias(h_seq.reshape(B * Sd, H),
                         params["dec_w_out"].astype(bf16),
                         params["dec_b_out"], out_dtype=jnp.float32)
    return logits.reshape(B, Sd, V), dec_state[None]


# ----------------------------------------------------------------------------
# Mixed-precision pure-JAX reference (lax.scan) for correctness check
# ----------------------------------------------------------------------------
def _q(x):
    """bf16 quantize-dequantize so the reference uses the same weights the
    bf16 kernel path sees."""
    return x.astype(jnp.bfloat16).astype(jnp.float32)


def _gru_ref(x_seq, h0, w_ih, w_hh, b_ih, b_hh):
    H = h0.shape[-1]

    def step(h, x):
        gi = jnp.dot(x, w_ih, preferred_element_type=jnp.float32) + b_ih
        gh = jnp.dot(h, w_hh, preferred_element_type=jnp.float32) + b_hh
        r = jax.nn.sigmoid(gi[:, :H] + gh[:, :H])
        z = jax.nn.sigmoid(gi[:, H:2 * H] + gh[:, H:2 * H])
        n = jnp.tanh(gi[:, 2 * H:] + r * gh[:, 2 * H:])
        h_new = (1.0 - z) * n + z * h
        return h_new, h_new

    hN, out = jax.lax.scan(step, h0, x_seq)
    return out, hN


def reference_forward(enc_X, dec_X, params):
    enc_emb = _q(jnp.transpose(jnp.take(params["enc_emb"], enc_X, axis=0), (1, 0, 2)))
    dec_emb = _q(jnp.transpose(jnp.take(params["dec_emb"], dec_X, axis=0), (1, 0, 2)))
    B = enc_X.shape[0]
    H = params["enc_w_hh"].shape[0]
    _, enc_state = _gru_ref(enc_emb, jnp.zeros((B, H), jnp.float32),
                            _q(params["enc_w_ih"]), _q(params["enc_w_hh"]),
                            params["enc_b_ih"], params["enc_b_hh"])
    dec_w_ih = jnp.concatenate([_q(params["dec_w_x"]), _q(params["dec_w_ctx"])], axis=0)
    ctx = jnp.broadcast_to(enc_state, dec_emb.shape[:1] + enc_state.shape)
    xc = jnp.concatenate([dec_emb, ctx], axis=-1)
    out, dec_state = _gru_ref(xc, enc_state, dec_w_ih, _q(params["dec_w_hh"]),
                              params["dec_b_ih"], params["dec_b_hh"])
    logits = out @ _q(params["dec_w_out"]) + params["dec_b_out"]
    return jnp.transpose(logits, (1, 0, 2)), dec_state[None]


# ----------------------------------------------------------------------------
def make_params(key, vocab, embed, hidden):
    ks = jax.random.split(key, 13)
    s = 0.1
    return {
        "enc_emb":   s * jax.random.normal(ks[0], (vocab, embed), jnp.float32),
        "enc_w_ih":  s * jax.random.normal(ks[1], (embed, 3 * hidden), jnp.float32),
        "enc_w_hh":  s * jax.random.normal(ks[2], (hidden, 3 * hidden), jnp.float32),
        "enc_b_ih":  s * jax.random.normal(ks[3], (1, 3 * hidden), jnp.float32),
        "enc_b_hh":  s * jax.random.normal(ks[4], (1, 3 * hidden), jnp.float32),
        "dec_emb":   s * jax.random.normal(ks[5], (vocab, embed), jnp.float32),
        # decoder input weight split into x-part and context-part
        "dec_w_x":   s * jax.random.normal(ks[6], (embed, 3 * hidden), jnp.float32),
        "dec_w_ctx": s * jax.random.normal(ks[7], (hidden, 3 * hidden), jnp.float32),
        "dec_w_hh":  s * jax.random.normal(ks[8], (hidden, 3 * hidden), jnp.float32),
        "dec_b_ih":  s * jax.random.normal(ks[9], (1, 3 * hidden), jnp.float32),
        "dec_b_hh":  s * jax.random.normal(ks[10], (1, 3 * hidden), jnp.float32),
        "dec_w_out": s * jax.random.normal(ks[11], (hidden, vocab), jnp.float32),
        "dec_b_out": s * jax.random.normal(ks[12], (1, vocab), jnp.float32),
    }


if __name__ == "__main__":
    key = jax.random.PRNGKey(0)
    k_p, k_e, k_d = jax.random.split(key, 3)

    batch, seq, vocab, embed, hidden = 2, 8, 16, 8, 32
    params = make_params(k_p, vocab, embed, hidden)

    enc_X = jax.random.randint(k_e, (batch, seq), 0, vocab, dtype=jnp.int32)
    dec_X = jax.random.randint(k_d, (batch, seq), 0, vocab, dtype=jnp.int32)

    out, state = encoder_decoder_forward(enc_X, dec_X, params)
    out = jax.block_until_ready(out)
    state = jax.block_until_ready(state)

    ref_out, ref_state = reference_forward(enc_X, dec_X, params)
    assert out.shape == (batch, seq, vocab)
    assert state.shape == (1, batch, hidden)
    # bf16-on-MXU kernel path vs bf16-quantized f32 reference: tolerance
    # loosened versus the previous all-f32 check.
    assert jnp.allclose(out, ref_out, atol=2e-2, rtol=2e-2)
    assert jnp.allclose(state, ref_state, atol=2e-2, rtol=2e-2)

    print("KERNEL_OK")
</pallas_src>

<mosaic_0001>
module attributes {stable_mosaic.version = 11 : i64} {
  func.func @matmul_bias_kernel(%arg0: i32, %arg1: i32, %arg2: memref<16x8xbf16, #tpu.memory_space<vmem>>, %arg3: memref<8x96xbf16, #tpu.memory_space<vmem>>, %arg4: memref<1x96xf32, #tpu.memory_space<vmem>>, %arg5: memref<16x96xbf16, #tpu.memory_space<vmem>>) attributes {dimension_semantics = [#tpu.dimension_semantics<parallel>, #tpu.dimension_semantics<parallel>], iteration_bounds = array<i64: 1, 1>, scalar_prefetch = 0 : i64, scratch_operands = 0 : i64, tpu.core_type = #tpu.core_type<tc>, window_params = [{transform_indices = @transform_0, window_bounds = array<i64: 16, 8>}, {transform_indices = @transform_1, window_bounds = array<i64: 8, 96>}, {transform_indices = @transform_2, window_bounds = array<i64: 1, 96>}, {transform_indices = @transform_3, window_bounds = array<i64: 16, 96>}]} {
    %c0 = arith.constant 0 : index
    %c0_0 = arith.constant 0 : index
    %0 = vector.load %arg2[%c0, %c0_0] : memref<16x8xbf16, #tpu.memory_space<vmem>>, vector<16x8xbf16>
    %c0_1 = arith.constant 0 : index
    %c0_2 = arith.constant 0 : index
    %1 = vector.load %arg3[%c0_1, %c0_2] : memref<8x96xbf16, #tpu.memory_space<vmem>>, vector<8x96xbf16>
    %cst = arith.constant dense<0.000000e+00> : vector<16x96xf32>
    %2 = tpu.matmul %0, %1, %cst {dimension_numbers = #tpu.dot_dimension_numbers<[1], [0], [0], [1], [0, 0, 1, 1], [], []>} : vector<16x8xbf16>, vector<8x96xbf16>, vector<16x96xf32> -> vector<16x96xf32>
    %c0_3 = arith.constant 0 : index
    %c0_4 = arith.constant 0 : index
    %3 = vector.load %arg4[%c0_3, %c0_4] : memref<1x96xf32, #tpu.memory_space<vmem>>, vector<1x96xf32>
    %4 = vector.broadcast %3 : vector<1x96xf32> to vector<16x96xf32>
    %5 = arith.addf %2, %4 : vector<16x96xf32>
    %6 = arith.truncf %5 : vector<16x96xf32> to vector<16x96xbf16>
    %c0_5 = arith.constant 0 : index
    %c0_6 = arith.constant 0 : index
    %7 = vector.load %arg5[%c0_5, %c0_6] : memref<16x96xbf16, #tpu.memory_space<vmem>>, vector<16x96xbf16>
    tpu.vector_store %arg5[%c0_5, %c0_6], %6 {strides = array<i32>} : memref<16x96xbf16, #tpu.memory_space<vmem>>, vector<16x96xbf16>,
    return
  }
  func.func @transform_0(%arg0: i32, %arg1: i32) -> (i32, i32) {
    %c0_i32 = arith.constant 0 : i32
    %c0_i32_0 = arith.constant 0 : i32
    return %arg0, %c0_i32 : i32, i32
  }
  func.func @transform_1(%arg0: i32, %arg1: i32) -> (i32, i32) {
    %c0_i32 = arith.constant 0 : i32
    %c0_i32_0 = arith.constant 0 : i32
    return %c0_i32, %arg1 : i32, i32
  }
  func.func @transform_2(%arg0: i32, %arg1: i32) -> (i32, i32) {
    %c0_i32 = arith.constant 0 : i32
    %c0_i32_0 = arith.constant 0 : i32
    return %c0_i32, %arg1 : i32, i32
  }
  func.func @transform_3(%arg0: i32, %arg1: i32) -> (i32, i32) {
    %c0_i32 = arith.constant 0 : i32
    return %arg0, %arg1 : i32, i32
  }
}

module attributes {stable_mosaic.version = 11 : i64} {
  func.func @encoder_recurrent_kernel(%arg0: i32, %arg1: i32, %arg2: memref<8x2x96xbf16, #tpu.memory_space<vmem>>, %arg3: memref<32x96xbf16, #tpu.memory_space<vmem>>, %arg4: memref<1x96xf32, #tpu.memory_space<vmem>>, %arg5: memref<2x32xf32, #tpu.memory_space<vmem>>, %arg6: memref<2x32xf32, #tpu.memory_space<vmem>>) attributes {dimension_semantics = [#tpu.dimension_semantics<parallel>, #tpu.dimension_semantics<arbitrary>], iteration_bounds = array<i64: 1, 1>, scalar_prefetch = 0 : i64, scratch_operands = 1 : i64, tpu.core_type = #tpu.core_type<tc>, window_params = [{transform_indices = @transform_0, window_bounds = array<i64: 8, 2, 96>}, {pipeline_mode = #tpu.pipeline_mode<synchronous>, transform_indices = @transform_1, window_bounds = array<i64: 32, 96>}, {pipeline_mode = #tpu.pipeline_mode<synchronous>, transform_indices = @transform_2, window_bounds = array<i64: 1, 96>}, {transform_indices = @transform_3, window_bounds = array<i64: 2, 32>}]} {
    %c0_i32 = arith.constant 0 : i32
    %0 = arith.cmpi eq, %arg1, %c0_i32 : i32
    %1 = arith.extui %0 : i1 to i32
    %c0_i32_0 = arith.constant 0 : i32
    %2 = arith.cmpi ne, %1, %c0_i32_0 : i32
    scf.if %2 {
      %cst_58 = arith.constant 0.000000e+00 : f32
      %268 = vector.broadcast %cst_58 : f32 to vector<2x32xf32>
      %c0_59 = arith.constant 0 : index
      %c0_60 = arith.constant 0 : index
      %269 = vector.load %arg6[%c0_59, %c0_60] : memref<2x32xf32, #tpu.memory_space<vmem>>, vector<2x32xf32>
      tpu.vector_store %arg6[%c0_59, %c0_60], %268 {strides = array<i32>} : memref<2x32xf32, #tpu.memory_space<vmem>>, vector<2x32xf32>,
    } else {
    }
    %c0 = arith.constant 0 : index
    %c0_1 = arith.constant 0 : index
    %3 = vector.load %arg3[%c0, %c0_1] : memref<32x96xbf16, #tpu.memory_space<vmem>>, vector<32x96xbf16>
    %c0_2 = arith.constant 0 : index
    %c0_3 = arith.constant 0 : index
    %4 = vector.load %arg4[%c0_2, %c0_3] : memref<1x96xf32, #tpu.memory_space<vmem>>, vector<1x96xf32>
    %5 = vector.shape_cast %4 : vector<1x96xf32> to vector<1x96xf32>
    %6 = vector.broadcast %5 : vector<1x96xf32> to vector<2x96xf32>
    %c0_4 = arith.constant 0 : index
    %c0_5 = arith.constant 0 : index
    %7 = vector.load %arg6[%c0_4, %c0_5] : memref<2x32xf32, #tpu.memory_space<vmem>>, vector<2x32xf32>
    %c0_6 = arith.constant 0 : index
    %c0_7 = arith.constant 0 : index
    %c0_8 = arith.constant 0 : index
    %8 = vector.load %arg2[%c0_6, %c0_7, %c0_8] : memref<8x2x96xbf16, #tpu.memory_space<vmem>>, vector<1x2x96xbf16>
    %9 = vector.shape_cast %8 : vector<1x2x96xbf16> to vector<2x96xbf16>
    %10 = arith.extf %9 : vector<2x96xbf16> to vector<2x96xf32>
    %11 = arith.truncf %7 : vector<2x32xf32> to vector<2x32xbf16>
    %cst = arith.constant dense<0.000000e+00> : vector<2x96xf32>
    %12 = tpu.matmul %11, %3, %cst {dimension_numbers = #tpu.dot_dimension_numbers<[1], [0], [0], [1], [0, 0, 1, 1], [], []>} : vector<2x32xbf16>, vector<32x96xbf16>, vector<2x96xf32> -> vector<2x96xf32>
    %13 = arith.addf %12, %6 : vector<2x96xf32>
    %14 = vector.extract_strided_slice %10 {offsets = [0, 0], sizes = [2, 32], strides = [1, 1]} : vector<2x96xf32> to vector<2x32xf32>
    %15 = vector.extract_strided_slice %13 {offsets = [0, 0], sizes = [2, 32], strides = [1, 1]} : vector<2x96xf32> to vector<2x32xf32>
    %16 = arith.addf %14, %15 : vector<2x32xf32>
    %17 = arith.negf %16 : vector<2x32xf32>
    %18 = math.exp %17 : vector<2x32xf32>
    %cst_9 = arith.constant 1.000000e+00 : f32
    %19 = vector.broadcast %cst_9 : f32 to vector<2x32xf32>
    %20 = arith.addf %19, %18 : vector<2x32xf32>
    %21 = arith.divf %19, %20 : vector<2x32xf32>
    %22 = vector.extract_strided_slice %10 {offsets = [0, 32], sizes = [2, 32], strides = [1, 1]} : vector<2x96xf32> to vector<2x32xf32>
    %23 = vector.extract_strided_slice %13 {offsets = [0, 32], sizes = [2, 32], strides = [1, 1]} : vector<2x96xf32> to vector<2x32xf32>
    %24 = arith.addf %22, %23 : vector<2x32xf32>
    %25 = arith.negf %24 : vector<2x32xf32>
    %26 = math.exp %25 : vector<2x32xf32>
    %cst_10 = arith.constant 1.000000e+00 : f32
    %27 = vector.broadcast %cst_10 : f32 to vector<2x32xf32>
    %28 = arith.addf %27, %26 : vector<2x32xf32>
    %29 = arith.divf %27, %28 : vector<2x32xf32>
    %30 = vector.extract_strided_slice %10 {offsets = [0, 64], sizes = [2, 32], strides = [1, 1]} : vector<2x96xf32> to vector<2x32xf32>
    %31 = vector.extract_strided_slice %13 {offsets = [0, 64], sizes = [2, 32], strides = [1, 1]} : vector<2x96xf32> to vector<2x32xf32>
    %32 = arith.mulf %21, %31 : vector<2x32xf32>
    %33 = arith.addf %30, %32 : vector<2x32xf32>
    %34 = math.tanh %33 : vector<2x32xf32>
    %cst_11 = arith.constant 1.000000e+00 : f32
    %35 = vector.broadcast %cst_11 : f32 to vector<2x32xf32>
    %36 = arith.subf %35, %29 : vector<2x32xf32>
    %37 = arith.mulf %36, %34 : vector<2x32xf32>
    %38 = arith.mulf %29, %7 : vector<2x32xf32>
    %39 = arith.addf %37, %38 : vector<2x32xf32>
    %c1 = arith.constant 1 : index
    %c0_12 = arith.constant 0 : index
    %c0_13 = arith.constant 0 : index
    %40 = vector.load %arg2[%c1, %c0_12, %c0_13] : memref<8x2x96xbf16, #tpu.memory_space<vmem>>, vector<1x2x96xbf16>
    %41 = vector.shape_cast %40 : vector<1x2x96xbf16> to vector<2x96xbf16>
    %42 = arith.extf %41 : vector<2x96xbf16> to vector<2x96xf32>
    %43 = arith.truncf %39 : vector<2x32xf32> to vector<2x32xbf16>
    %cst_14 = arith.constant dense<0.000000e+00> : vector<2x96xf32>
    %44 = tpu.matmul %43, %3, %cst_14 {dimension_numbers = #tpu.dot_dimension_numbers<[1], [0], [0], [1], [0, 0, 1, 1], [], []>} : vector<2x32xbf16>, vector<32x96xbf16>, vector<2x96xf32> -> vector<2x96xf32>
    %45 = arith.addf %44, %6 : vector<2x96xf32>
    %46 = vector.extract_strided_slice %42 {offsets = [0, 0], sizes = [2, 32], strides = [1, 1]} : vector<2x96xf32> to vector<2x32xf32>
    %47 = vector.extract_strided_slice %45 {offsets = [0, 0], sizes = [2, 32], strides = [1, 1]} : vector<2x96xf32> to vector<2x32xf32>
    %48 = arith.addf %46, %47 : vector<2x32xf32>
    %49 = arith.negf %48 : vector<2x32xf32>
    %50 = math.exp %49 : vector<2x32xf32>
    %cst_15 = arith.constant 1.000000e+00 : f32
    %51 = vector.broadcast %cst_15 : f32 to vector<2x32xf32>
    %52 = arith.addf %51, %50 : vector<2x32xf32>
    %53 = arith.divf %51, %52 : vector<2x32xf32>
    %54 = vector.extract_strided_slice %42 {offsets = [0, 32], sizes = [2, 32], strides = [1, 1]} : vector<2x96xf32> to vector<2x32xf32>
    %55 = vector.extract_strided_slice %45 {offsets = [0, 32], sizes = [2, 32], strides = [1, 1]} : vector<2x96xf32> to vector<2x32xf32>
    %56 = arith.addf %54, %55 : vector<2x32xf32>
    %57 = arith.negf %56 : vector<2x32xf32>
    %58 = math.exp %57 : vector<2x32xf32>
    %cst_16 = arith.constant 1.000000e+00 : f32
    %59 = vector.broadcast %cst_16 : f32 to vector<2x32xf32>
    %60 = arith.addf %59, %58 : vector<2x32xf32>
    %61 = arith.divf %59, %60 : vector<2x32xf32>
    %62 = vector.extract_strided_slice %42 {offsets = [0, 64], sizes = [2, 32], strides = [1, 1]} : vector<2x96xf32> to vector<2x32xf32>
    %63 = vector.extract_strided_slice %45 {offsets = [0, 64], sizes = [2, 32], strides = [1, 1]} : vector<2x96xf32> to vector<2x32xf32>
    %64 = arith.mulf %53, %63 : vector<2x32xf32>
    %65 = arith.addf %62, %64 : vector<2x32xf32>
    %66 = math.tanh %65 : vector<2x32xf32>
    %cst_17 = arith.constant 1.000000e+00 : f32
    %67 = vector.broadcast %cst_17 : f32 to vector<2x32xf32>
    %68 = arith.subf %67, %61 : vector<2x32xf32>
    %69 = arith.mulf %68, %66 : vector<2x32xf32>
    %70 = arith.mulf %61, %39 : vector<2x32xf32>
    %71 = arith.addf %69, %70 : vector<2x32xf32>
    %c2 = arith.constant 2 : index
    %c0_18 = arith.constant 0 : index
    %c0_19 = arith.constant 0 : index
    %72 = vector.load %arg2[%c2, %c0_18, %c0_19] : memref<8x2x96xbf16, #tpu.memory_space<vmem>>, vector<1x2x96xbf16>
    %73 = vector.shape_cast %72 : vector<1x2x96xbf16> to vector<2x96xbf16>
    %74 = arith.extf %73 : vector<2x96xbf16> to vector<2x96xf32>
    %75 = arith.truncf %71 : vector<2x32xf32> to vector<2x32xbf16>
    %cst_20 = arith.constant dense<0.000000e+00> : vector<2x96xf32>
    %76 = tpu.matmul %75, %3, %cst_20 {dimension_numbers = #tpu.dot_dimension_numbers<[1], [0], [0], [1], [0, 0, 1, 1], [], []>} : vector<2x32xbf16>, vector<32x96xbf16>, vector<2x96xf32> -> vector<2x96xf32>
    %77 = arith.addf %76, %6 : vector<2x96xf32>
    %78 = vector.extract_strided_slice %74 {offsets = [0, 0], sizes = [2, 32], strides = [1, 1]} : vector<2x96xf32> to vector<2x32xf32>
    %79 = vector.extract_strided_slice %77 {offsets = [0, 0], sizes = [2, 32], strides = [1, 1]} : vector<2x96xf32> to vector<2x32xf32>
    %80 = arith.addf %78, %79 : vector<2x32xf32>
    %81 = arith.negf %80 : vector<2x32xf32>
    %82 = math.exp %81 : vector<2x32xf32>
    %cst_21 = arith.constant 1.000000e+00 : f32
    %83 = vector.broadcast %cst_21 : f32 to vector<2x32xf32>
    %84 = arith.addf %83, %82 : vector<2x32xf32>
    %85 = arith.divf %83, %84 : vector<2x32xf32>
    %86 = vector.extract_strided_slice %74 {offsets = [0, 32], sizes = [2, 32], strides = [1, 1]} : vector<2x96xf32> to vector<2x32xf32>
    %87 = vector.extract_strided_slice %77 {offsets = [0, 32], sizes = [2, 32], strides = [1, 1]} : vector<2x96xf32> to vector<2x32xf32>
    %88 = arith.addf %86, %87 : vector<2x32xf32>
    %89 = arith.negf %88 : vector<2x32xf32>
    %90 = math.exp %89 : vector<2x32xf32>
    %cst_22 = arith.constant 1.000000e+00 : f32
    %91 = vector.broadcast %cst_22 : f32 to vector<2x32xf32>
    %92 = arith.addf %91, %90 : vector<2x32xf32>
    %93 = arith.divf %91, %92 : vector<2x32xf32>
    %94 = vector.extract_strided_slice %74 {offsets = [0, 64], sizes = [2, 32], strides = [1, 1]} : vector<2x96xf32> to vector<2x32xf32>
    %95 = vector.extract_strided_slice %77 {offsets = [0, 64], sizes = [2, 32], strides = [1, 1]} : vector<2x96xf32> to vector<2x32xf32>
    %96 = arith.mulf %85, %95 : vector<2x32xf32>
    %97 = arith.addf %94, %96 : vector<2x32xf32>
    %98 = math.tanh %97 : vector<2x32xf32>
    %cst_23 = arith.constant 1.000000e+00 : f32
    %99 = vector.broadcast %cst_23 : f32 to vector<2x32xf32>
    %100 = arith.subf %99, %93 : vector<2x32xf32>
    %101 = arith.mulf %100, %98 : vector<2x32xf32>
    %102 = arith.mulf %93, %71 : vector<2x32xf32>
    %103 = arith.addf %101, %102 : vector<2x32xf32>
    %c3 = arith.constant 3 : index
    %c0_24 = arith.constant 0 : index
    %c0_25 = arith.constant 0 : index
    %104 = vector.load %arg2[%c3, %c0_24, %c0_25] : memref<8x2x96xbf16, #tpu.memory_space<vmem>>, vector<1x2x96xbf16>
    %105 = vector.shape_cast %104 : vector<1x2x96xbf16> to vector<2x96xbf16>
    %106 = arith.extf %105 : vector<2x96xbf16> to vector<2x96xf32>
    %107 = arith.truncf %103 : vector<2x32xf32> to vector<2x32xbf16>
    %cst_26 = arith.constant dense<0.000000e+00> : vector<2x96xf32>
    %108 = tpu.matmul %107, %3, %cst_26 {dimension_numbers = #tpu.dot_dimension_numbers<[1], [0], [0], [1], [0, 0, 1, 1], [], []>} : vector<2x32xbf16>, vector<32x96xbf16>, vector<2x96xf32> -> vector<2x96xf32>
    %109 = arith.addf %108, %6 : vector<2x96xf32>
    %110 = vector.extract_strided_slice %106 {offsets = [0, 0], sizes = [2, 32], strides = [1, 1]} : vector<2x96xf32> to vector<2x32xf32>
    %111 = vector.extract_strided_slice %109 {offsets = [0, 0], sizes = [2, 32], strides = [1, 1]} : vector<2x96xf32> to vector<2x32xf32>
    %112 = arith.addf %110, %111 : vector<2x32xf32>
    %113 = arith.negf %112 : vector<2x32xf32>
    %114 = math.exp %113 : vector<2x32xf32>
    %cst_27 = arith.constant 1.000000e+00 : f32
    %115 = vector.broadcast %cst_27 : f32 to vector<2x32xf32>
    %116 = arith.addf %115, %114 : vector<2x32xf32>
    %117 = arith.divf %115, %116 : vector<2x32xf32>
    %118 = vector.extract_strided_slice %106 {offsets = [0, 32], sizes = [2, 32], strides = [1, 1]} : vector<2x96xf32> to vector<2x32xf32>
    %119 = vector.extract_strided_slice %109 {offsets = [0, 32], sizes = [2, 32], strides = [1, 1]} : vector<2x96xf32> to vector<2x32xf32>
    %120 = arith.addf %118, %119 : vector<2x32xf32>
    %121 = arith.negf %120 : vector<2x32xf32>
    %122 = math.exp %121 : vector<2x32xf32>
    %cst_28 = arith.constant 1.000000e+00 : f32
    %123 = vector.broadcast %cst_28 : f32 to vector<2x32xf32>
    %124 = arith.addf %123, %122 : vector<2x32xf32>
    %125 = arith.divf %123, %124 : vector<2x32xf32>
    %126 = vector.extract_strided_slice %106 {offsets = [0, 64], sizes = [2, 32], strides = [1, 1]} : vector<2x96xf32> to vector<2x32xf32>
    %127 = vector.extract_strided_slice %109 {offsets = [0, 64], sizes = [2, 32], strides = [1, 1]} : vector<2x96xf32> to vector<2x32xf32>
    %128 = arith.mulf %117, %127 : vector<2x32xf32>
    %129 = arith.addf %126, %128 : vector<2x32xf32>
    %130 = math.tanh %129 : vector<2x32xf32>
    %cst_29 = arith.constant 1.000000e+00 : f32
    %131 = vector.broadcast %cst_29 : f32 to vector<2x32xf32>
    %132 = arith.subf %131, %125 : vector<2x32xf32>
    %133 = arith.mulf %132, %130 : vector<2x32xf32>
    %134 = arith.mulf %125, %103 : vector<2x32xf32>
    %135 = arith.addf %133, %134 : vector<2x32xf32>
    %c4 = arith.constant 4 : index
    %c0_30 = arith.constant 0 : index
    %c0_31 = arith.constant 0 : index
    %136 = vector.load %arg2[%c4, %c0_30, %c0_31] : memref<8x2x96xbf16, #tpu.memory_space<vmem>>, vector<1x2x96xbf16>
    %137 = vector.shape_cast %136 : vector<1x2x96xbf16> to vector<2x96xbf16>
    %138 = arith.extf %137 : vector<2x96xbf16> to vector<2x96xf32>
    %139 = arith.truncf %135 : vector<2x32xf32> to vector<2x32xbf16>
    %cst_32 = arith.constant dense<0.000000e+00> : vector<2x96xf32>
    %140 = tpu.matmul %139, %3, %cst_32 {dimension_numbers = #tpu.dot_dimension_numbers<[1], [0], [0], [1], [0, 0, 1, 1], [], []>} : vector<2x32xbf16>, vector<32x96xbf16>, vector<2x96xf32> -> vector<2x96xf32>
    %141 = arith.addf %140, %6 : vector<2x96xf32>
    %142 = vector.extract_strided_slice %138 {offsets = [0, 0], sizes = [2, 32], strides = [1, 1]} : vector<2x96xf32> to vector<2x32xf32>
    %143 = vector.extract_strided_slice %141 {offsets = [0, 0], sizes = [2, 32], strides = [1, 1]} : vector<2x96xf32> to vector<2x32xf32>
    %144 = arith.addf %142, %143 : vector<2x32xf32>
    %145 = arith.negf %144 : vector<2x32xf32>
    %146 = math.exp %145 : vector<2x32xf32>
    %cst_33 = arith.constant 1.000000e+00 : f32
    %147 = vector.broadcast %cst_33 : f32 to vector<2x32xf32>
    %148 = arith.addf %147, %146 : vector<2x32xf32>
    %149 = arith.divf %147, %148 : vector<2x32xf32>
    %150 = vector.extract_strided_slice %138 {offsets = [0, 32], sizes = [2, 32], strides = [1, 1]} : vector<2x96xf32> to vector<2x32xf32>
    %151 = vector.extract_strided_slice %141 {offsets = [0, 32], sizes = [2, 32], strides = [1, 1]} : vector<2x96xf32> to vector<2x32xf32>
    %152 = arith.addf %150, %151 : vector<2x32xf32>
    %153 = arith.negf %152 : vector<2x32xf32>
    %154 = math.exp %153 : vector<2x32xf32>
    %cst_34 = arith.constant 1.000000e+00 : f32
    %155 = vector.broadcast %cst_34 : f32 to vector<2x32xf32>
    %156 = arith.addf %155, %154 : vector<2x32xf32>
    %157 = arith.divf %155, %156 : vector<2x32xf32>
    %158 = vector.extract_strided_slice %138 {offsets = [0, 64], sizes = [2, 32], strides = [1, 1]} : vector<2x96xf32> to vector<2x32xf32>
    %159 = vector.extract_strided_slice %141 {offsets = [0, 64], sizes = [2, 32], strides = [1, 1]} : vector<2x96xf32> to vector<2x32xf32>
    %160 = arith.mulf %149, %159 : vector<2x32xf32>
    %161 = arith.addf %158, %160 : vector<2x32xf32>
    %162 = math.tanh %161 : vector<2x32xf32>
    %cst_35 = arith.constant 1.000000e+00 : f32
    %163 = vector.broadcast %cst_35 : f32 to vector<2x32xf32>
    %164 = arith.subf %163, %157 : vector<2x32xf32>
    %165 = arith.mulf %164, %162 : vector<2x32xf32>
    %166 = arith.mulf %157, %135 : vector<2x32xf32>
    %167 = arith.addf %165, %166 : vector<2x32xf32>
    %c5 = arith.constant 5 : index
    %c0_36 = arith.constant 0 : index
    %c0_37 = arith.constant 0 : index
    %168 = vector.load %arg2[%c5, %c0_36, %c0_37] : memref<8x2x96xbf16, #tpu.memory_space<vmem>>, vector<1x2x96xbf16>
    %169 = vector.shape_cast %168 : vector<1x2x96xbf16> to vector<2x96xbf16>
    %170 = arith.extf %169 : vector<2x96xbf16> to vector<2x96xf32>
    %171 = arith.truncf %167 : vector<2x32xf32> to vector<2x32xbf16>
    %cst_38 = arith.constant dense<0.000000e+00> : vector<2x96xf32>
    %172 = tpu.matmul %171, %3, %cst_38 {dimension_numbers = #tpu.dot_dimension_numbers<[1], [0], [0], [1], [0, 0, 1, 1], [], []>} : vector<2x32xbf16>, vector<32x96xbf16>, vector<2x96xf32> -> vector<2x96xf32>
    %173 = arith.addf %172, %6 : vector<2x96xf32>
    %174 = vector.extract_strided_slice %170 {offsets = [0, 0], sizes = [2, 32], strides = [1, 1]} : vector<2x96xf32> to vector<2x32xf32>
    %175 = vector.extract_strided_slice %173 {offsets = [0, 0], sizes = [2, 32], strides = [1, 1]} : vector<2x96xf32> to vector<2x32xf32>
    %176 = arith.addf %174, %175 : vector<2x32xf32>
    %177 = arith.negf %176 : vector<2x32xf32>
    %178 = math.exp %177 : vector<2x32xf32>
    %cst_39 = arith.constant 1.000000e+00 : f32
    %179 = vector.broadcast %cst_39 : f32 to vector<2x32xf32>
    %180 = arith.addf %179, %178 : vector<2x32xf32>
    %181 = arith.divf %179, %180 : vector<2x32xf32>
    %182 = vector.extract_strided_slice %170 {offsets = [0, 32], sizes = [2, 32], strides = [1, 1]} : vector<2x96xf32> to vector<2x32xf32>
    %183 = vector.extract_strided_slice %173 {offsets = [0, 32], sizes = [2, 32], strides = [1, 1]} : vector<2x96xf32> to vector<2x32xf32>
    %184 = arith.addf %182, %183 : vector<2x32xf32>
    %185 = arith.negf %184 : vector<2x32xf32>
    %186 = math.exp %185 : vector<2x32xf32>
    %cst_40 = arith.constant 1.000000e+00 : f32
    %187 = vector.broadcast %cst_40 : f32 to vector<2x32xf32>
    %188 = arith.addf %187, %186 : vector<2x32xf32>
    %189 = arith.divf %187, %188 : vector<2x32xf32>
    %190 = vector.extract_strided_slice %170 {offsets = [0, 64], sizes = [2, 32], strides = [1, 1]} : vector<2x96xf32> to vector<2x32xf32>
    %191 = vector.extract_strided_slice %173 {offsets = [0, 64], sizes = [2, 32], strides = [1, 1]} : vector<2x96xf32> to vector<2x32xf32>
    %192 = arith.mulf %181, %191 : vector<2x32xf32>
    %193 = arith.addf %190, %192 : vector<2x32xf32>
    %194 = math.tanh %193 : vector<2x32xf32>
    %cst_41 = arith.constant 1.000000e+00 : f32
    %195 = vector.broadcast %cst_41 : f32 to vector<2x32xf32>
    %196 = arith.subf %195, %189 : vector<2x32xf32>
    %197 = arith.mulf %196, %194 : vector<2x32xf32>
    %198 = arith.mulf %189, %167 : vector<2x32xf32>
    %199 = arith.addf %197, %198 : vector<2x32xf32>
    %c6 = arith.constant 6 : index
    %c0_42 = arith.constant 0 : index
    %c0_43 = arith.constant 0 : index
    %200 = vector.load %arg2[%c6, %c0_42, %c0_43] : memref<8x2x96xbf16, #tpu.memory_space<vmem>>, vector<1x2x96xbf16>
    %201 = vector.shape_cast %200 : vector<1x2x96xbf16> to vector<2x96xbf16>
    %202 = arith.extf %201 : vector<2x96xbf16> to vector<2x96xf32>
    %203 = arith.truncf %199 : vector<2x32xf32> to vector<2x32xbf16>
    %cst_44 = arith.constant dense<0.000000e+00> : vector<2x96xf32>
    %204 = tpu.matmul %203, %3, %cst_44 {dimension_numbers = #tpu.dot_dimension_numbers<[1], [0], [0], [1], [0, 0, 1, 1], [], []>} : vector<2x32xbf16>, vector<32x96xbf16>, vector<2x96xf32> -> vector<2x96xf32>
    %205 = arith.addf %204, %6 : vector<2x96xf32>
    %206 = vector.extract_strided_slice %202 {offsets = [0, 0], sizes = [2, 32], strides = [1, 1]} : vector<2x96xf32> to vector<2x32xf32>
    %207 = vector.extract_strided_slice %205 {offsets = [0, 0], sizes = [2, 32], strides = [1, 1]} : vector<2x96xf32> to vector<2x32xf32>
    %208 = arith.addf %206, %207 : vector<2x32xf32>
    %209 = arith.negf %208 : vector<2x32xf32>
    %210 = math.exp %209 : vector<2x32xf32>
    %cst_45 = arith.constant 1.000000e+00 : f32
    %211 = vector.broadcast %cst_45 : f32 to vector<2x32xf32>
    %212 = arith.addf %211, %210 : vector<2x32xf32>
    %213 = arith.divf %211, %212 : vector<2x32xf32>
    %214 = vector.extract_strided_slice %202 {offsets = [0, 32], sizes = [2, 32], strides = [1, 1]} : vector<2x96xf32> to vector<2x32xf32>
    %215 = vector.extract_strided_slice %205 {offsets = [0, 32], sizes = [2, 32], strides = [1, 1]} : vector<2x96xf32> to vector<2x32xf32>
    %216 = arith.addf %214, %215 : vector<2x32xf32>
    %217 = arith.negf %216 : vector<2x32xf32>
    %218 = math.exp %217 : vector<2x32xf32>
    %cst_46 = arith.constant 1.000000e+00 : f32
    %219 = vector.broadcast %cst_46 : f32 to vector<2x32xf32>
    %220 = arith.addf %219, %218 : vector<2x32xf32>
    %221 = arith.divf %219, %220 : vector<2x32xf32>
    %222 = vector.extract_strided_slice %202 {offsets = [0, 64], sizes = [2, 32], strides = [1, 1]} : vector<2x96xf32> to vector<2x32xf32>
    %223 = vector.extract_strided_slice %205 {offsets = [0, 64], sizes = [2, 32], strides = [1, 1]} : vector<2x96xf32> to vector<2x32xf32>
    %224 = arith.mulf %213, %223 : vector<2x32xf32>
    %225 = arith.addf %222, %224 : vector<2x32xf32>
    %226 = math.tanh %225 : vector<2x32xf32>
    %cst_47 = arith.constant 1.000000e+00 : f32
    %227 = vector.broadcast %cst_47 : f32 to vector<2x32xf32>
    %228 = arith.subf %227, %221 : vector<2x32xf32>
    %229 = arith.mulf %228, %226 : vector<2x32xf32>
    %230 = arith.mulf %221, %199 : vector<2x32xf32>
    %231 = arith.addf %229, %230 : vector<2x32xf32>
    %c7 = arith.constant 7 : index
    %c0_48 = arith.constant 0 : index
    %c0_49 = arith.constant 0 : index
    %232 = vector.load %arg2[%c7, %c0_48, %c0_49] : memref<8x2x96xbf16, #tpu.memory_space<vmem>>, vector<1x2x96xbf16>
    %233 = vector.shape_cast %232 : vector<1x2x96xbf16> to vector<2x96xbf16>
    %234 = arith.extf %233 : vector<2x96xbf16> to vector<2x96xf32>
    %235 = arith.truncf %231 : vector<2x32xf32> to vector<2x32xbf16>
    %cst_50 = arith.constant dense<0.000000e+00> : vector<2x96xf32>
    %236 = tpu.matmul %235, %3, %cst_50 {dimension_numbers = #tpu.dot_dimension_numbers<[1], [0], [0], [1], [0, 0, 1, 1], [], []>} : vector<2x32xbf16>, vector<32x96xbf16>, vector<2x96xf32> -> vector<2x96xf32>
    %237 = arith.addf %236, %6 : vector<2x96xf32>
    %238 = vector.extract_strided_slice %234 {offsets = [0, 0], sizes = [2, 32], strides = [1, 1]} : vector<2x96xf32> to vector<2x32xf32>
    %239 = vector.extract_strided_slice %237 {offsets = [0, 0], sizes = [2, 32], strides = [1, 1]} : vector<2x96xf32> to vector<2x32xf32>
    %240 = arith.addf %238, %239 : vector<2x32xf32>
    %241 = arith.negf %240 : vector<2x32xf32>
    %242 = math.exp %241 : vector<2x32xf32>
    %cst_51 = arith.constant 1.000000e+00 : f32
    %243 = vector.broadcast %cst_51 : f32 to vector<2x32xf32>
    %244 = arith.addf %243, %242 : vector<2x32xf32>
    %245 = arith.divf %243, %244 : vector<2x32xf32>
    %246 = vector.extract_strided_slice %234 {offsets = [0, 32], sizes = [2, 32], strides = [1, 1]} : vector<2x96xf32> to vector<2x32xf32>
    %247 = vector.extract_strided_slice %237 {offsets = [0, 32], sizes = [2, 32], strides = [1, 1]} : vector<2x96xf32> to vector<2x32xf32>
    %248 = arith.addf %246, %247 : vector<2x32xf32>
    %249 = arith.negf %248 : vector<2x32xf32>
    %250 = math.exp %249 : vector<2x32xf32>
    %cst_52 = arith.constant 1.000000e+00 : f32
    %251 = vector.broadcast %cst_52 : f32 to vector<2x32xf32>
    %252 = arith.addf %251, %250 : vector<2x32xf32>
    %253 = arith.divf %251, %252 : vector<2x32xf32>
    %254 = vector.extract_strided_slice %234 {offsets = [0, 64], sizes = [2, 32], strides = [1, 1]} : vector<2x96xf32> to vector<2x32xf32>
    %255 = vector.extract_strided_slice %237 {offsets = [0, 64], sizes = [2, 32], strides = [1, 1]} : vector<2x96xf32> to vector<2x32xf32>
    %256 = arith.mulf %245, %255 : vector<2x32xf32>
    %257 = arith.addf %254, %256 : vector<2x32xf32>
    %258 = math.tanh %257 : vector<2x32xf32>
    %cst_53 = arith.constant 1.000000e+00 : f32
    %259 = vector.broadcast %cst_53 : f32 to vector<2x32xf32>
    %260 = arith.subf %259, %253 : vector<2x32xf32>
    %261 = arith.mulf %260, %258 : vector<2x32xf32>
    %262 = arith.mulf %253, %231 : vector<2x32xf32>
    %263 = arith.addf %261, %262 : vector<2x32xf32>
    %c0_54 = arith.constant 0 : index
    %c0_55 = arith.constant 0 : index
    %264 = vector.load %arg6[%c0_54, %c0_55] : memref<2x32xf32, #tpu.memory_space<vmem>>, vector<2x32xf32>
    tpu.vector_store %arg6[%c0_54, %c0_55], %263 {strides = array<i32>} : memref<2x32xf32, #tpu.memory_space<vmem>>, vector<2x32xf32>,
    %c0_i32_56 = arith.constant 0 : i32
    %265 = arith.cmpi eq, %arg1, %c0_i32_56 : i32
    %266 = arith.extui %265 : i1 to i32
    %c0_i32_57 = arith.constant 0 : i32
    %267 = arith.cmpi ne, %266, %c0_i32_57 : i32
    scf.if %267 {
      %c0_58 = arith.constant 0 : index
      %c0_59 = arith.constant 0 : index
      %268 = vector.load %arg5[%c0_58, %c0_59] : memref<2x32xf32, #tpu.memory_space<vmem>>, vector<2x32xf32>
      tpu.vector_store %arg5[%c0_58, %c0_59], %263 {strides = array<i32>} : memref<2x32xf32, #tpu.memory_space<vmem>>, vector<2x32xf32>,
    } else {
    }
    return
  }
  func.func @transform_0(%arg0: i32, %arg1: i32) -> (i32, i32, i32) {
    %c0_i32 = arith.constant 0 : i32
    %c0_i32_0 = arith.constant 0 : i32
    return %arg1, %arg0, %c0_i32 : i32, i32, i32
  }
  func.func @transform_1(%arg0: i32, %arg1: i32) -> (i32, i32) {
    %c0_i32 = arith.constant 0 : i32
    %c0_i32_0 = arith.constant 0 : i32
    %c0_i32_1 = arith.constant 0 : i32
    return %c0_i32, %c0_i32_0 : i32, i32
  }
  func.func @transform_2(%arg0: i32, %arg1: i32) -> (i32, i32) {
    %c0_i32 = arith.constant 0 : i32
    %c0_i32_0 = arith.constant 0 : i32
    %c0_i32_1 = arith.constant 0 : i32
    return %c0_i32, %c0_i32_0 : i32, i32
  }
  func.func @transform_3(%arg0: i32, %arg1: i32) -> (i32, i32) {
    %c0_i32 = arith.constant 0 : i32
    %c0_i32_0 = arith.constant 0 : i32
    return %arg0, %c0_i32 : i32, i32
  }
}

module attributes {stable_mosaic.version = 11 : i64} {
  func.func @matmul_bias_kernel(%arg0: i32, %arg1: i32, %arg2: memref<16x32xbf16, #tpu.memory_space<vmem>>, %arg3: memref<32x16xbf16, #tpu.memory_space<vmem>>, %arg4: memref<1x16xf32, #tpu.memory_space<vmem>>, %arg5: memref<16x16xf32, #tpu.memory_space<vmem>>) attributes {dimension_semantics = [#tpu.dimension_semantics<parallel>, #tpu.dimension_semantics<parallel>], iteration_bounds = array<i64: 1, 1>, scalar_prefetch = 0 : i64, scratch_operands = 0 : i64, tpu.core_type = #tpu.core_type<tc>, window_params = [{transform_indices = @transform_0, window_bounds = array<i64: 16, 32>}, {transform_indices = @transform_1, window_bounds = array<i64: 32, 16>}, {transform_indices = @transform_2, window_bounds = array<i64: 1, 16>}, {transform_indices = @transform_3, window_bounds = array<i64: 16, 16>}]} {
    %c0 = arith.constant 0 : index
    %c0_0 = arith.constant 0 : index
    %0 = vector.load %arg2[%c0, %c0_0] : memref<16x32xbf16, #tpu.memory_space<vmem>>, vector<16x32xbf16>
    %c0_1 = arith.constant 0 : index
    %c0_2 = arith.constant 0 : index
    %1 = vector.load %arg3[%c0_1, %c0_2] : memref<32x16xbf16, #tpu.memory_space<vmem>>, vector<32x16xbf16>
    %cst = arith.constant dense<0.000000e+00> : vector<16x16xf32>
    %2 = tpu.matmul %0, %1, %cst {dimension_numbers = #tpu.dot_dimension_numbers<[1], [0], [0], [1], [0, 0, 1, 1], [], []>} : vector<16x32xbf16>, vector<32x16xbf16>, vector<16x16xf32> -> vector<16x16xf32>
    %c0_3 = arith.constant 0 : index
    %c0_4 = arith.constant 0 : index
    %3 = vector.load %arg4[%c0_3, %c0_4] : memref<1x16xf32, #tpu.memory_space<vmem>>, vector<1x16xf32>
    %4 = vector.broadcast %3 : vector<1x16xf32> to vector<16x16xf32>
    %5 = arith.addf %2, %4 : vector<16x16xf32>
    %c0_5 = arith.constant 0 : index
    %c0_6 = arith.constant 0 : index
    %6 = vector.load %arg5[%c0_5, %c0_6] : memref<16x16xf32, #tpu.memory_space<vmem>>, vector<16x16xf32>
    tpu.vector_store %arg5[%c0_5, %c0_6], %5 {strides = array<i32>} : memref<16x16xf32, #tpu.memory_space<vmem>>, vector<16x16xf32>,
    return
  }
  func.func @transform_0(%arg0: i32, %arg1: i32) -> (i32, i32) {
    %c0_i32 = arith.constant 0 : i32
    %c0_i32_0 = arith.constant 0 : i32
    return %arg0, %c0_i32 : i32, i32
  }
  func.func @transform_1(%arg0: i32, %arg1: i32) -> (i32, i32) {
    %c0_i32 = arith.constant 0 : i32
    %c0_i32_0 = arith.constant 0 : i32
    return %c0_i32, %arg1 : i32, i32
  }
  func.func @transform_2(%arg0: i32, %arg1: i32) -> (i32, i32) {
    %c0_i32 = arith.constant 0 : i32
    %c0_i32_0 = arith.constant 0 : i32
    return %c0_i32, %arg1 : i32, i32
  }
  func.func @transform_3(%arg0: i32, %arg1: i32) -> (i32, i32) {
    %c0_i32 = arith.constant 0 : i32
    return %arg0, %arg1 : i32, i32
  }
}

module attributes {stable_mosaic.version = 11 : i64} {
  func.func @decoder_recurrent_kernel(%arg0: i32, %arg1: i32, %arg2: memref<8x2x96xbf16, #tpu.memory_space<vmem>>, %arg3: memref<2x32xf32, #tpu.memory_space<vmem>>, %arg4: memref<32x96xbf16, #tpu.memory_space<vmem>>, %arg5: memref<32x96xbf16, #tpu.memory_space<vmem>>, %arg6: memref<1x96xf32, #tpu.memory_space<vmem>>, %arg7: memref<2x8x32xbf16, #tpu.memory_space<vmem>>, %arg8: memref<2x32xf32, #tpu.memory_space<vmem>>, %arg9: memref<2x32xf32, #tpu.memory_space<vmem>>, %arg10: memref<2x96xf32, #tpu.memory_space<vmem>>) attributes {dimension_semantics = [#tpu.dimension_semantics<parallel>, #tpu.dimension_semantics<arbitrary>], iteration_bounds = array<i64: 1, 1>, scalar_prefetch = 0 : i64, scratch_operands = 2 : i64, tpu.core_type = #tpu.core_type<tc>, window_params = [{transform_indices = @transform_0, window_bounds = array<i64: 8, 2, 96>}, {transform_indices = @transform_1, window_bounds = array<i64: 2, 32>}, {pipeline_mode = #tpu.pipeline_mode<synchronous>, transform_indices = @transform_2, window_bounds = array<i64: 32, 96>}, {pipeline_mode = #tpu.pipeline_mode<synchronous>, transform_indices = @transform_3, window_bounds = array<i64: 32, 96>}, {pipeline_mode = #tpu.pipeline_mode<synchronous>, transform_indices = @transform_4, window_bounds = array<i64: 1, 96>}, {transform_indices = @transform_5, window_bounds = array<i64: 2, 8, 32>}, {transform_indices = @transform_6, window_bounds = array<i64: 2, 32>}]} {
    %c0_i32 = arith.constant 0 : i32
    %0 = arith.cmpi eq, %arg1, %c0_i32 : i32
    %1 = arith.extui %0 : i1 to i32
    %c0_i32_0 = arith.constant 0 : i32
    %2 = arith.cmpi ne, %1, %c0_i32_0 : i32
    scf.if %2 {
      %c0_84 = arith.constant 0 : index
      %c0_85 = arith.constant 0 : index
      %309 = vector.load %arg3[%c0_84, %c0_85] : memref<2x32xf32, #tpu.memory_space<vmem>>, vector<2x32xf32>
      %c0_86 = arith.constant 0 : index
      %c0_87 = arith.constant 0 : index
      %310 = vector.load %arg9[%c0_86, %c0_87] : memref<2x32xf32, #tpu.memory_space<vmem>>, vector<2x32xf32>
      tpu.vector_store %arg9[%c0_86, %c0_87], %309 {strides = array<i32>} : memref<2x32xf32, #tpu.memory_space<vmem>>, vector<2x32xf32>,
      %311 = arith.truncf %309 : vector<2x32xf32> to vector<2x32xbf16>
      %c0_88 = arith.constant 0 : index
      %c0_89 = arith.constant 0 : index
      %312 = vector.load %arg4[%c0_88, %c0_89] : memref<32x96xbf16, #tpu.memory_space<vmem>>, vector<32x96xbf16>
      %cst_90 = arith.constant dense<0.000000e+00> : vector<2x96xf32>
      %313 = tpu.matmul %311, %312, %cst_90 {dimension_numbers = #tpu.dot_dimension_numbers<[1], [0], [0], [1], [0, 0, 1, 1], [], []>} : vector<2x32xbf16>, vector<32x96xbf16>, vector<2x96xf32> -> vector<2x96xf32>
      %c0_91 = arith.constant 0 : index
      %c0_92 = arith.constant 0 : index
      %314 = vector.load %arg10[%c0_91, %c0_92] : memref<2x96xf32, #tpu.memory_space<vmem>>, vector<2x96xf32>
      tpu.vector_store %arg10[%c0_91, %c0_92], %313 {strides = array<i32>} : memref<2x96xf32, #tpu.memory_space<vmem>>, vector<2x96xf32>,
    } else {
    }
    %c0 = arith.constant 0 : index
    %c0_1 = arith.constant 0 : index
    %3 = vector.load %arg5[%c0, %c0_1] : memref<32x96xbf16, #tpu.memory_space<vmem>>, vector<32x96xbf16>
    %c0_2 = arith.constant 0 : index
    %c0_3 = arith.constant 0 : index
    %4 = vector.load %arg10[%c0_2, %c0_3] : memref<2x96xf32, #tpu.memory_space<vmem>>, vector<2x96xf32>
    %c0_4 = arith.constant 0 : index
    %c0_5 = arith.constant 0 : index
    %5 = vector.load %arg6[%c0_4, %c0_5] : memref<1x96xf32, #tpu.memory_space<vmem>>, vector<1x96xf32>
    %6 = vector.shape_cast %5 : vector<1x96xf32> to vector<1x96xf32>
    %7 = vector.broadcast %6 : vector<1x96xf32> to vector<2x96xf32>
    %c0_6 = arith.constant 0 : index
    %c0_7 = arith.constant 0 : index
    %8 = vector.load %arg9[%c0_6, %c0_7] : memref<2x32xf32, #tpu.memory_space<vmem>>, vector<2x32xf32>
    %c0_8 = arith.constant 0 : index
    %c0_9 = arith.constant 0 : index
    %c0_10 = arith.constant 0 : index
    %9 = vector.load %arg2[%c0_8, %c0_9, %c0_10] : memref<8x2x96xbf16, #tpu.memory_space<vmem>>, vector<1x2x96xbf16>
    %10 = vector.shape_cast %9 : vector<1x2x96xbf16> to vector<2x96xbf16>
    %11 = arith.extf %10 : vector<2x96xbf16> to vector<2x96xf32>
    %12 = arith.addf %11, %4 : vector<2x96xf32>
    %13 = arith.truncf %8 : vector<2x32xf32> to vector<2x32xbf16>
    %cst = arith.constant dense<0.000000e+00> : vector<2x96xf32>
    %14 = tpu.matmul %13, %3, %cst {dimension_numbers = #tpu.dot_dimension_numbers<[1], [0], [0], [1], [0, 0, 1, 1], [], []>} : vector<2x32xbf16>, vector<32x96xbf16>, vector<2x96xf32> -> vector<2x96xf32>
    %15 = arith.addf %14, %7 : vector<2x96xf32>
    %16 = vector.extract_strided_slice %12 {offsets = [0, 0], sizes = [2, 32], strides = [1, 1]} : vector<2x96xf32> to vector<2x32xf32>
    %17 = vector.extract_strided_slice %15 {offsets = [0, 0], sizes = [2, 32], strides = [1, 1]} : vector<2x96xf32> to vector<2x32xf32>
    %18 = arith.addf %16, %17 : vector<2x32xf32>
    %19 = arith.negf %18 : vector<2x32xf32>
    %20 = math.exp %19 : vector<2x32xf32>
    %cst_11 = arith.constant 1.000000e+00 : f32
    %21 = vector.broadcast %cst_11 : f32 to vector<2x32xf32>
    %22 = arith.addf %21, %20 : vector<2x32xf32>
    %23 = arith.divf %21, %22 : vector<2x32xf32>
    %24 = vector.extract_strided_slice %12 {offsets = [0, 32], sizes = [2, 32], strides = [1, 1]} : vector<2x96xf32> to vector<2x32xf32>
    %25 = vector.extract_strided_slice %15 {offsets = [0, 32], sizes = [2, 32], strides = [1, 1]} : vector<2x96xf32> to vector<2x32xf32>
    %26 = arith.addf %24, %25 : vector<2x32xf32>
    %27 = arith.negf %26 : vector<2x32xf32>
    %28 = math.exp %27 : vector<2x32xf32>
    %cst_12 = arith.constant 1.000000e+00 : f32
    %29 = vector.broadcast %cst_12 : f32 to vector<2x32xf32>
    %30 = arith.addf %29, %28 : vector<2x32xf32>
    %31 = arith.divf %29, %30 : vector<2x32xf32>
    %32 = vector.extract_strided_slice %12 {offsets = [0, 64], sizes = [2, 32], strides = [1, 1]} : vector<2x96xf32> to vector<2x32xf32>
    %33 = vector.extract_strided_slice %15 {offsets = [0, 64], sizes = [2, 32], strides = [1, 1]} : vector<2x96xf32> to vector<2x32xf32>
    %34 = arith.mulf %23, %33 : vector<2x32xf32>
    %35 = arith.addf %32, %34 : vector<2x32xf32>
    %36 = math.tanh %35 : vector<2x32xf32>
    %cst_13 = arith.constant 1.000000e+00 : f32
    %37 = vector.broadcast %cst_13 : f32 to vector<2x32xf32>
    %38 = arith.subf %37, %31 : vector<2x32xf32>
    %39 = arith.mulf %38, %36 : vector<2x32xf32>
    %40 = arith.mulf %31, %8 : vector<2x32xf32>
    %41 = arith.addf %39, %40 : vector<2x32xf32>
    %42 = arith.truncf %41 : vector<2x32xf32> to vector<2x32xbf16>
    %c0_14 = arith.constant 0 : index
    %c0_15 = arith.constant 0 : index
    %c0_16 = arith.constant 0 : index
    %43 = vector.load %arg7[%c0_14, %c0_15, %c0_16] : memref<2x8x32xbf16, #tpu.memory_space<vmem>>, vector<2x1x32xbf16>
    %44 = vector.shape_cast %43 : vector<2x1x32xbf16> to vector<2x32xbf16>
    %45 = vector.shape_cast %42 : vector<2x32xbf16> to vector<2x1x32xbf16>
    tpu.vector_store %arg7[%c0_14, %c0_15, %c0_16], %45 {strides = array<i32>} : memref<2x8x32xbf16, #tpu.memory_space<vmem>>, vector<2x1x32xbf16>,
    %c1 = arith.constant 1 : index
    %c0_17 = arith.constant 0 : index
    %c0_18 = arith.constant 0 : index
    %46 = vector.load %arg2[%c1, %c0_17, %c0_18] : memref<8x2x96xbf16, #tpu.memory_space<vmem>>, vector<1x2x96xbf16>
    %47 = vector.shape_cast %46 : vector<1x2x96xbf16> to vector<2x96xbf16>
    %48 = arith.extf %47 : vector<2x96xbf16> to vector<2x96xf32>
    %49 = arith.addf %48, %4 : vector<2x96xf32>
    %50 = arith.truncf %41 : vector<2x32xf32> to vector<2x32xbf16>
    %cst_19 = arith.constant dense<0.000000e+00> : vector<2x96xf32>
    %51 = tpu.matmul %50, %3, %cst_19 {dimension_numbers = #tpu.dot_dimension_numbers<[1], [0], [0], [1], [0, 0, 1, 1], [], []>} : vector<2x32xbf16>, vector<32x96xbf16>, vector<2x96xf32> -> vector<2x96xf32>
    %52 = arith.addf %51, %7 : vector<2x96xf32>
    %53 = vector.extract_strided_slice %49 {offsets = [0, 0], sizes = [2, 32], strides = [1, 1]} : vector<2x96xf32> to vector<2x32xf32>
    %54 = vector.extract_strided_slice %52 {offsets = [0, 0], sizes = [2, 32], strides = [1, 1]} : vector<2x96xf32> to vector<2x32xf32>
    %55 = arith.addf %53, %54 : vector<2x32xf32>
    %56 = arith.negf %55 : vector<2x32xf32>
    %57 = math.exp %56 : vector<2x32xf32>
    %cst_20 = arith.constant 1.000000e+00 : f32
    %58 = vector.broadcast %cst_20 : f32 to vector<2x32xf32>
    %59 = arith.addf %58, %57 : vector<2x32xf32>
    %60 = arith.divf %58, %59 : vector<2x32xf32>
    %61 = vector.extract_strided_slice %49 {offsets = [0, 32], sizes = [2, 32], strides = [1, 1]} : vector<2x96xf32> to vector<2x32xf32>
    %62 = vector.extract_strided_slice %52 {offsets = [0, 32], sizes = [2, 32], strides = [1, 1]} : vector<2x96xf32> to vector<2x32xf32>
    %63 = arith.addf %61, %62 : vector<2x32xf32>
    %64 = arith.negf %63 : vector<2x32xf32>
    %65 = math.exp %64 : vector<2x32xf32>
    %cst_21 = arith.constant 1.000000e+00 : f32
    %66 = vector.broadcast %cst_21 : f32 to vector<2x32xf32>
    %67 = arith.addf %66, %65 : vector<2x32xf32>
    %68 = arith.divf %66, %67 : vector<2x32xf32>
    %69 = vector.extract_strided_slice %49 {offsets = [0, 64], sizes = [2, 32], strides = [1, 1]} : vector<2x96xf32> to vector<2x32xf32>
    %70 = vector.extract_strided_slice %52 {offsets = [0, 64], sizes = [2, 32], strides = [1, 1]} : vector<2x96xf32> to vector<2x32xf32>
    %71 = arith.mulf %60, %70 : vector<2x32xf32>
    %72 = arith.addf %69, %71 : vector<2x32xf32>
    %73 = math.tanh %72 : vector<2x32xf32>
    %cst_22 = arith.constant 1.000000e+00 : f32
    %74 = vector.broadcast %cst_22 : f32 to vector<2x32xf32>
    %75 = arith.subf %74, %68 : vector<2x32xf32>
    %76 = arith.mulf %75, %73 : vector<2x32xf32>
    %77 = arith.mulf %68, %41 : vector<2x32xf32>
    %78 = arith.addf %76, %77 : vector<2x32xf32>
    %79 = arith.truncf %78 : vector<2x32xf32> to vector<2x32xbf16>
    %c0_23 = arith.constant 0 : index
    %c1_24 = arith.constant 1 : index
    %c0_25 = arith.constant 0 : index
    %80 = vector.load %arg7[%c0_23, %c1_24, %c0_25] : memref<2x8x32xbf16, #tpu.memory_space<vmem>>, vector<2x1x32xbf16>
    %81 = vector.shape_cast %80 : vector<2x1x32xbf16> to vector<2x32xbf16>
    %82 = vector.shape_cast %79 : vector<2x32xbf16> to vector<2x1x32xbf16>
    tpu.vector_store %arg7[%c0_23, %c1_24, %c0_25], %82 {strides = array<i32>} : memref<2x8x32xbf16, #tpu.memory_space<vmem>>, vector<2x1x32xbf16>,
    %c2 = arith.constant 2 : index
    %c0_26 = arith.constant 0 : index
    %c0_27 = arith.constant 0 : index
    %83 = vector.load %arg2[%c2, %c0_26, %c0_27] : memref<8x2x96xbf16, #tpu.memory_space<vmem>>, vector<1x2x96xbf16>
    %84 = vector.shape_cast %83 : vector<1x2x96xbf16> to vector<2x96xbf16>
    %85 = arith.extf %84 : vector<2x96xbf16> to vector<2x96xf32>
    %86 = arith.addf %85, %4 : vector<2x96xf32>
    %87 = arith.truncf %78 : vector<2x32xf32> to vector<2x32xbf16>
    %cst_28 = arith.constant dense<0.000000e+00> : vector<2x96xf32>
    %88 = tpu.matmul %87, %3, %cst_28 {dimension_numbers = #tpu.dot_dimension_numbers<[1], [0], [0], [1], [0, 0, 1, 1], [], []>} : vector<2x32xbf16>, vector<32x96xbf16>, vector<2x96xf32> -> vector<2x96xf32>
    %89 = arith.addf %88, %7 : vector<2x96xf32>
    %90 = vector.extract_strided_slice %86 {offsets = [0, 0], sizes = [2, 32], strides = [1, 1]} : vector<2x96xf32> to vector<2x32xf32>
    %91 = vector.extract_strided_slice %89 {offsets = [0, 0], sizes = [2, 32], strides = [1, 1]} : vector<2x96xf32> to vector<2x32xf32>
    %92 = arith.addf %90, %91 : vector<2x32xf32>
    %93 = arith.negf %92 : vector<2x32xf32>
    %94 = math.exp %93 : vector<2x32xf32>
    %cst_29 = arith.constant 1.000000e+00 : f32
    %95 = vector.broadcast %cst_29 : f32 to vector<2x32xf32>
    %96 = arith.addf %95, %94 : vector<2x32xf32>
    %97 = arith.divf %95, %96 : vector<2x32xf32>
    %98 = vector.extract_strided_slice %86 {offsets = [0, 32], sizes = [2, 32], strides = [1, 1]} : vector<2x96xf32> to vector<2x32xf32>
    %99 = vector.extract_strided_slice %89 {offsets = [0, 32], sizes = [2, 32], strides = [1, 1]} : vector<2x96xf32> to vector<2x32xf32>
    %100 = arith.addf %98, %99 : vector<2x32xf32>
    %101 = arith.negf %100 : vector<2x32xf32>
    %102 = math.exp %101 : vector<2x32xf32>
    %cst_30 = arith.constant 1.000000e+00 : f32
    %103 = vector.broadcast %cst_30 : f32 to vector<2x32xf32>
    %104 = arith.addf %103, %102 : vector<2x32xf32>
    %105 = arith.divf %103, %104 : vector<2x32xf32>
    %106 = vector.extract_strided_slice %86 {offsets = [0, 64], sizes = [2, 32], strides = [1, 1]} : vector<2x96xf32> to vector<2x32xf32>
    %107 = vector.extract_strided_slice %89 {offsets = [0, 64], sizes = [2, 32], strides = [1, 1]} : vector<2x96xf32> to vector<2x32xf32>
    %108 = arith.mulf %97, %107 : vector<2x32xf32>
    %109 = arith.addf %106, %108 : vector<2x32xf32>
    %110 = math.tanh %109 : vector<2x32xf32>
    %cst_31 = arith.constant 1.000000e+00 : f32
    %111 = vector.broadcast %cst_31 : f32 to vector<2x32xf32>
    %112 = arith.subf %111, %105 : vector<2x32xf32>
    %113 = arith.mulf %112, %110 : vector<2x32xf32>
    %114 = arith.mulf %105, %78 : vector<2x32xf32>
    %115 = arith.addf %113, %114 : vector<2x32xf32>
    %116 = arith.truncf %115 : vector<2x32xf32> to vector<2x32xbf16>
    %c0_32 = arith.constant 0 : index
    %c2_33 = arith.constant 2 : index
    %c0_34 = arith.constant 0 : index
    %117 = vector.load %arg7[%c0_32, %c2_33, %c0_34] : memref<2x8x32xbf16, #tpu.memory_space<vmem>>, vector<2x1x32xbf16>
    %118 = vector.shape_cast %117 : vector<2x1x32xbf16> to vector<2x32xbf16>
    %119 = vector.shape_cast %116 : vector<2x32xbf16> to vector<2x1x32xbf16>
    tpu.vector_store %arg7[%c0_32, %c2_33, %c0_34], %119 {strides = array<i32>} : memref<2x8x32xbf16, #tpu.memory_space<vmem>>, vector<2x1x32xbf16>,
    %c3 = arith.constant 3 : index
    %c0_35 = arith.constant 0 : index
    %c0_36 = arith.constant 0 : index
    %120 = vector.load %arg2[%c3, %c0_35, %c0_36] : memref<8x2x96xbf16, #tpu.memory_space<vmem>>, vector<1x2x96xbf16>
    %121 = vector.shape_cast %120 : vector<1x2x96xbf16> to vector<2x96xbf16>
    %122 = arith.extf %121 : vector<2x96xbf16> to vector<2x96xf32>
    %123 = arith.addf %122, %4 : vector<2x96xf32>
    %124 = arith.truncf %115 : vector<2x32xf32> to vector<2x32xbf16>
    %cst_37 = arith.constant dense<0.000000e+00> : vector<2x96xf32>
    %125 = tpu.matmul %124, %3, %cst_37 {dimension_numbers = #tpu.dot_dimension_numbers<[1], [0], [0], [1], [0, 0, 1, 1], [], []>} : vector<2x32xbf16>, vector<32x96xbf16>, vector<2x96xf32> -> vector<2x96xf32>
    %126 = arith.addf %125, %7 : vector<2x96xf32>
    %127 = vector.extract_strided_slice %123 {offsets = [0, 0], sizes = [2, 32], strides = [1, 1]} : vector<2x96xf32> to vector<2x32xf32>
    %128 = vector.extract_strided_slice %126 {offsets = [0, 0], sizes = [2, 32], strides = [1, 1]} : vector<2x96xf32> to vector<2x32xf32>
    %129 = arith.addf %127, %128 : vector<2x32xf32>
    %130 = arith.negf %129 : vector<2x32xf32>
    %131 = math.exp %130 : vector<2x32xf32>
    %cst_38 = arith.constant 1.000000e+00 : f32
    %132 = vector.broadcast %cst_38 : f32 to vector<2x32xf32>
    %133 = arith.addf %132, %131 : vector<2x32xf32>
    %134 = arith.divf %132, %133 : vector<2x32xf32>
    %135 = vector.extract_strided_slice %123 {offsets = [0, 32], sizes = [2, 32], strides = [1, 1]} : vector<2x96xf32> to vector<2x32xf32>
    %136 = vector.extract_strided_slice %126 {offsets = [0, 32], sizes = [2, 32], strides = [1, 1]} : vector<2x96xf32> to vector<2x32xf32>
    %137 = arith.addf %135, %136 : vector<2x32xf32>
    %138 = arith.negf %137 : vector<2x32xf32>
    %139 = math.exp %138 : vector<2x32xf32>
    %cst_39 = arith.constant 1.000000e+00 : f32
    %140 = vector.broadcast %cst_39 : f32 to vector<2x32xf32>
    %141 = arith.addf %140, %139 : vector<2x32xf32>
    %142 = arith.divf %140, %141 : vector<2x32xf32>
    %143 = vector.extract_strided_slice %123 {offsets = [0, 64], sizes = [2, 32], strides = [1, 1]} : vector<2x96xf32> to vector<2x32xf32>
    %144 = vector.extract_strided_slice %126 {offsets = [0, 64], sizes = [2, 32], strides = [1, 1]} : vector<2x96xf32> to vector<2x32xf32>
    %145 = arith.mulf %134, %144 : vector<2x32xf32>
    %146 = arith.addf %143, %145 : vector<2x32xf32>
    %147 = math.tanh %146 : vector<2x32xf32>
    %cst_40 = arith.constant 1.000000e+00 : f32
    %148 = vector.broadcast %cst_40 : f32 to vector<2x32xf32>
    %149 = arith.subf %148, %142 : vector<2x32xf32>
    %150 = arith.mulf %149, %147 : vector<2x32xf32>
    %151 = arith.mulf %142, %115 : vector<2x32xf32>
    %152 = arith.addf %150, %151 : vector<2x32xf32>
    %153 = arith.truncf %152 : vector<2x32xf32> to vector<2x32xbf16>
    %c0_41 = arith.constant 0 : index
    %c3_42 = arith.constant 3 : index
    %c0_43 = arith.constant 0 : index
    %154 = vector.load %arg7[%c0_41, %c3_42, %c0_43] : memref<2x8x32xbf16, #tpu.memory_space<vmem>>, vector<2x1x32xbf16>
    %155 = vector.shape_cast %154 : vector<2x1x32xbf16> to vector<2x32xbf16>
    %156 = vector.shape_cast %153 : vector<2x32xbf16> to vector<2x1x32xbf16>
    tpu.vector_store %arg7[%c0_41, %c3_42, %c0_43], %156 {strides = array<i32>} : memref<2x8x32xbf16, #tpu.memory_space<vmem>>, vector<2x1x32xbf16>,
    %c4 = arith.constant 4 : index
    %c0_44 = arith.constant 0 : index
    %c0_45 = arith.constant 0 : index
    %157 = vector.load %arg2[%c4, %c0_44, %c0_45] : memref<8x2x96xbf16, #tpu.memory_space<vmem>>, vector<1x2x96xbf16>
    %158 = vector.shape_cast %157 : vector<1x2x96xbf16> to vector<2x96xbf16>
    %159 = arith.extf %158 : vector<2x96xbf16> to vector<2x96xf32>
    %160 = arith.addf %159, %4 : vector<2x96xf32>
    %161 = arith.truncf %152 : vector<2x32xf32> to vector<2x32xbf16>
    %cst_46 = arith.constant dense<0.000000e+00> : vector<2x96xf32>
    %162 = tpu.matmul %161, %3, %cst_46 {dimension_numbers = #tpu.dot_dimension_numbers<[1], [0], [0], [1], [0, 0, 1, 1], [], []>} : vector<2x32xbf16>, vector<32x96xbf16>, vector<2x96xf32> -> vector<2x96xf32>
    %163 = arith.addf %162, %7 : vector<2x96xf32>
    %164 = vector.extract_strided_slice %160 {offsets = [0, 0], sizes = [2, 32], strides = [1, 1]} : vector<2x96xf32> to vector<2x32xf32>
    %165 = vector.extract_strided_slice %163 {offsets = [0, 0], sizes = [2, 32], strides = [1, 1]} : vector<2x96xf32> to vector<2x32xf32>
    %166 = arith.addf %164, %165 : vector<2x32xf32>
    %167 = arith.negf %166 : vector<2x32xf32>
    %168 = math.exp %167 : vector<2x32xf32>
    %cst_47 = arith.constant 1.000000e+00 : f32
    %169 = vector.broadcast %cst_47 : f32 to vector<2x32xf32>
    %170 = arith.addf %169, %168 : vector<2x32xf32>
    %171 = arith.divf %169, %170 : vector<2x32xf32>
    %172 = vector.extract_strided_slice %160 {offsets = [0, 32], sizes = [2, 32], strides = [1, 1]} : vector<2x96xf32> to vector<2x32xf32>
    %173 = vector.extract_strided_slice %163 {offsets = [0, 32], sizes = [2, 32], strides = [1, 1]} : vector<2x96xf32> to vector<2x32xf32>
    %174 = arith.addf %172, %173 : vector<2x32xf32>
    %175 = arith.negf %174 : vector<2x32xf32>
    %176 = math.exp %175 : vector<2x32xf32>
    %cst_48 = arith.constant 1.000000e+00 : f32
    %177 = vector.broadcast %cst_48 : f32 to vector<2x32xf32>
    %178 = arith.addf %177, %176 : vector<2x32xf32>
    %179 = arith.divf %177, %178 : vector<2x32xf32>
    %180 = vector.extract_strided_slice %160 {offsets = [0, 64], sizes = [2, 32], strides = [1, 1]} : vector<2x96xf32> to vector<2x32xf32>
    %181 = vector.extract_strided_slice %163 {offsets = [0, 64], sizes = [2, 32], strides = [1, 1]} : vector<2x96xf32> to vector<2x32xf32>
    %182 = arith.mulf %171, %181 : vector<2x32xf32>
    %183 = arith.addf %180, %182 : vector<2x32xf32>
    %184 = math.tanh %183 : vector<2x32xf32>
    %cst_49 = arith.constant 1.000000e+00 : f32
    %185 = vector.broadcast %cst_49 : f32 to vector<2x32xf32>
    %186 = arith.subf %185, %179 : vector<2x32xf32>
    %187 = arith.mulf %186, %184 : vector<2x32xf32>
    %188 = arith.mulf %179, %152 : vector<2x32xf32>
    %189 = arith.addf %187, %188 : vector<2x32xf32>
    %190 = arith.truncf %189 : vector<2x32xf32> to vector<2x32xbf16>
    %c0_50 = arith.constant 0 : index
    %c4_51 = arith.constant 4 : index
    %c0_52 = arith.constant 0 : index
    %191 = vector.load %arg7[%c0_50, %c4_51, %c0_52] : memref<2x8x32xbf16, #tpu.memory_space<vmem>>, vector<2x1x32xbf16>
    %192 = vector.shape_cast %191 : vector<2x1x32xbf16> to vector<2x32xbf16>
    %193 = vector.shape_cast %190 : vector<2x32xbf16> to vector<2x1x32xbf16>
    tpu.vector_store %arg7[%c0_50, %c4_51, %c0_52], %193 {strides = array<i32>} : memref<2x8x32xbf16, #tpu.memory_space<vmem>>, vector<2x1x32xbf16>,
    %c5 = arith.constant 5 : index
    %c0_53 = arith.constant 0 : index
    %c0_54 = arith.constant 0 : index
    %194 = vector.load %arg2[%c5, %c0_53, %c0_54] : memref<8x2x96xbf16, #tpu.memory_space<vmem>>, vector<1x2x96xbf16>
    %195 = vector.shape_cast %194 : vector<1x2x96xbf16> to vector<2x96xbf16>
    %196 = arith.extf %195 : vector<2x96xbf16> to vector<2x96xf32>
    %197 = arith.addf %196, %4 : vector<2x96xf32>
    %198 = arith.truncf %189 : vector<2x32xf32> to vector<2x32xbf16>
    %cst_55 = arith.constant dense<0.000000e+00> : vector<2x96xf32>
    %199 = tpu.matmul %198, %3, %cst_55 {dimension_numbers = #tpu.dot_dimension_numbers<[1], [0], [0], [1], [0, 0, 1, 1], [], []>} : vector<2x32xbf16>, vector<32x96xbf16>, vector<2x96xf32> -> vector<2x96xf32>
    %200 = arith.addf %199, %7 : vector<2x96xf32>
    %201 = vector.extract_strided_slice %197 {offsets = [0, 0], sizes = [2, 32], strides = [1, 1]} : vector<2x96xf32> to vector<2x32xf32>
    %202 = vector.extract_strided_slice %200 {offsets = [0, 0], sizes = [2, 32], strides = [1, 1]} : vector<2x96xf32> to vector<2x32xf32>
    %203 = arith.addf %201, %202 : vector<2x32xf32>
    %204 = arith.negf %203 : vector<2x32xf32>
    %205 = math.exp %204 : vector<2x32xf32>
    %cst_56 = arith.constant 1.000000e+00 : f32
    %206 = vector.broadcast %cst_56 : f32 to vector<2x32xf32>
    %207 = arith.addf %206, %205 : vector<2x32xf32>
    %208 = arith.divf %206, %207 : vector<2x32xf32>
    %209 = vector.extract_strided_slice %197 {offsets = [0, 32], sizes = [2, 32], strides = [1, 1]} : vector<2x96xf32> to vector<2x32xf32>
    %210 = vector.extract_strided_slice %200 {offsets = [0, 32], sizes = [2, 32], strides = [1, 1]} : vector<2x96xf32> to vector<2x32xf32>
    %211 = arith.addf %209, %210 : vector<2x32xf32>
    %212 = arith.negf %211 : vector<2x32xf32>
    %213 = math.exp %212 : vector<2x32xf32>
    %cst_57 = arith.constant 1.000000e+00 : f32
    %214 = vector.broadcast %cst_57 : f32 to vector<2x32xf32>
    %215 = arith.addf %214, %213 : vector<2x32xf32>
    %216 = arith.divf %214, %215 : vector<2x32xf32>
    %217 = vector.extract_strided_slice %197 {offsets = [0, 64], sizes = [2, 32], strides = [1, 1]} : vector<2x96xf32> to vector<2x32xf32>
    %218 = vector.extract_strided_slice %200 {offsets = [0, 64], sizes = [2, 32], strides = [1, 1]} : vector<2x96xf32> to vector<2x32xf32>
    %219 = arith.mulf %208, %218 : vector<2x32xf32>
    %220 = arith.addf %217, %219 : vector<2x32xf32>
    %221 = math.tanh %220 : vector<2x32xf32>
    %cst_58 = arith.constant 1.000000e+00 : f32
    %222 = vector.broadcast %cst_58 : f32 to vector<2x32xf32>
    %223 = arith.subf %222, %216 : vector<2x32xf32>
    %224 = arith.mulf %223, %221 : vector<2x32xf32>
    %225 = arith.mulf %216, %189 : vector<2x32xf32>
    %226 = arith.addf %224, %225 : vector<2x32xf32>
    %227 = arith.truncf %226 : vector<2x32xf32> to vector<2x32xbf16>
    %c0_59 = arith.constant 0 : index
    %c5_60 = arith.constant 5 : index
    %c0_61 = arith.constant 0 : index
    %228 = vector.load %arg7[%c0_59, %c5_60, %c0_61] : memref<2x8x32xbf16, #tpu.memory_space<vmem>>, vector<2x1x32xbf16>
    %229 = vector.shape_cast %228 : vector<2x1x32xbf16> to vector<2x32xbf16>
    %230 = vector.shape_cast %227 : vector<2x32xbf16> to vector<2x1x32xbf16>
    tpu.vector_store %arg7[%c0_59, %c5_60, %c0_61], %230 {strides = array<i32>} : memref<2x8x32xbf16, #tpu.memory_space<vmem>>, vector<2x1x32xbf16>,
    %c6 = arith.constant 6 : index
    %c0_62 = arith.constant 0 : index
    %c0_63 = arith.constant 0 : index
    %231 = vector.load %arg2[%c6, %c0_62, %c0_63] : memref<8x2x96xbf16, #tpu.memory_space<vmem>>, vector<1x2x96xbf16>
    %232 = vector.shape_cast %231 : vector<1x2x96xbf16> to vector<2x96xbf16>
    %233 = arith.extf %232 : vector<2x96xbf16> to vector<2x96xf32>
    %234 = arith.addf %233, %4 : vector<2x96xf32>
    %235 = arith.truncf %226 : vector<2x32xf32> to vector<2x32xbf16>
    %cst_64 = arith.constant dense<0.000000e+00> : vector<2x96xf32>
    %236 = tpu.matmul %235, %3, %cst_64 {dimension_numbers = #tpu.dot_dimension_numbers<[1], [0], [0], [1], [0, 0, 1, 1], [], []>} : vector<2x32xbf16>, vector<32x96xbf16>, vector<2x96xf32> -> vector<2x96xf32>
    %237 = arith.addf %236, %7 : vector<2x96xf32>
    %238 = vector.extract_strided_slice %234 {offsets = [0, 0], sizes = [2, 32], strides = [1, 1]} : vector<2x96xf32> to vector<2x32xf32>
    %239 = vector.extract_strided_slice %237 {offsets = [0, 0], sizes = [2, 32], strides = [1, 1]} : vector<2x96xf32> to vector<2x32xf32>
    %240 = arith.addf %238, %239 : vector<2x32xf32>
    %241 = arith.negf %240 : vector<2x32xf32>
    %242 = math.exp %241 : vector<2x32xf32>
    %cst_65 = arith.constant 1.000000e+00 : f32
    %243 = vector.broadcast %cst_65 : f32 to vector<2x32xf32>
    %244 = arith.addf %243, %242 : vector<2x32xf32>
    %245 = arith.divf %243, %244 : vector<2x32xf32>
    %246 = vector.extract_strided_slice %234 {offsets = [0, 32], sizes = [2, 32], strides = [1, 1]} : vector<2x96xf32> to vector<2x32xf32>
    %247 = vector.extract_strided_slice %237 {offsets = [0, 32], sizes = [2, 32], strides = [1, 1]} : vector<2x96xf32> to vector<2x32xf32>
    %248 = arith.addf %246, %247 : vector<2x32xf32>
    %249 = arith.negf %248 : vector<2x32xf32>
    %250 = math.exp %249 : vector<2x32xf32>
    %cst_66 = arith.constant 1.000000e+00 : f32
    %251 = vector.broadcast %cst_66 : f32 to vector<2x32xf32>
    %252 = arith.addf %251, %250 : vector<2x32xf32>
    %253 = arith.divf %251, %252 : vector<2x32xf32>
    %254 = vector.extract_strided_slice %234 {offsets = [0, 64], sizes = [2, 32], strides = [1, 1]} : vector<2x96xf32> to vector<2x32xf32>
    %255 = vector.extract_strided_slice %237 {offsets = [0, 64], sizes = [2, 32], strides = [1, 1]} : vector<2x96xf32> to vector<2x32xf32>
    %256 = arith.mulf %245, %255 : vector<2x32xf32>
    %257 = arith.addf %254, %256 : vector<2x32xf32>
    %258 = math.tanh %257 : vector<2x32xf32>
    %cst_67 = arith.constant 1.000000e+00 : f32
    %259 = vector.broadcast %cst_67 : f32 to vector<2x32xf32>
    %260 = arith.subf %259, %253 : vector<2x32xf32>
    %261 = arith.mulf %260, %258 : vector<2x32xf32>
    %262 = arith.mulf %253, %226 : vector<2x32xf32>
    %263 = arith.addf %261, %262 : vector<2x32xf32>
    %264 = arith.truncf %263 : vector<2x32xf32> to vector<2x32xbf16>
    %c0_68 = arith.constant 0 : index
    %c6_69 = arith.constant 6 : index
    %c0_70 = arith.constant 0 : index
    %265 = vector.load %arg7[%c0_68, %c6_69, %c0_70] : memref<2x8x32xbf16, #tpu.memory_space<vmem>>, vector<2x1x32xbf16>
    %266 = vector.shape_cast %265 : vector<2x1x32xbf16> to vector<2x32xbf16>
    %267 = vector.shape_cast %264 : vector<2x32xbf16> to vector<2x1x32xbf16>
    tpu.vector_store %arg7[%c0_68, %c6_69, %c0_70], %267 {strides = array<i32>} : memref<2x8x32xbf16, #tpu.memory_space<vmem>>, vector<2x1x32xbf16>,
    %c7 = arith.constant 7 : index
    %c0_71 = arith.constant 0 : index
    %c0_72 = arith.constant 0 : index
    %268 = vector.load %arg2[%c7, %c0_71, %c0_72] : memref<8x2x96xbf16, #tpu.memory_space<vmem>>, vector<1x2x96xbf16>
    %269 = vector.shape_cast %268 : vector<1x2x96xbf16> to vector<2x96xbf16>
    %270 = arith.extf %269 : vector<2x96xbf16> to vector<2x96xf32>
    %271 = arith.addf %270, %4 : vector<2x96xf32>
    %272 = arith.truncf %263 : vector<2x32xf32> to vector<2x32xbf16>
    %cst_73 = arith.constant dense<0.000000e+00> : vector<2x96xf32>
    %273 = tpu.matmul %272, %3, %cst_73 {dimension_numbers = #tpu.dot_dimension_numbers<[1], [0], [0], [1], [0, 0, 1, 1], [], []>} : vector<2x32xbf16>, vector<32x96xbf16>, vector<2x96xf32> -> vector<2x96xf32>
    %274 = arith.addf %273, %7 : vector<2x96xf32>
    %275 = vector.extract_strided_slice %271 {offsets = [0, 0], sizes = [2, 32], strides = [1, 1]} : vector<2x96xf32> to vector<2x32xf32>
    %276 = vector.extract_strided_slice %274 {offsets = [0, 0], sizes = [2, 32], strides = [1, 1]} : vector<2x96xf32> to vector<2x32xf32>
    %277 = arith.addf %275, %276 : vector<2x32xf32>
    %278 = arith.negf %277 : vector<2x32xf32>
    %279 = math.exp %278 : vector<2x32xf32>
    %cst_74 = arith.constant 1.000000e+00 : f32
    %280 = vector.broadcast %cst_74 : f32 to vector<2x32xf32>
    %281 = arith.addf %280, %279 : vector<2x32xf32>
    %282 = arith.divf %280, %281 : vector<2x32xf32>
    %283 = vector.extract_strided_slice %271 {offsets = [0, 32], sizes = [2, 32], strides = [1, 1]} : vector<2x96xf32> to vector<2x32xf32>
    %284 = vector.extract_strided_slice %274 {offsets = [0, 32], sizes = [2, 32], strides = [1, 1]} : vector<2x96xf32> to vector<2x32xf32>
    %285 = arith.addf %283, %284 : vector<2x32xf32>
    %286 = arith.negf %285 : vector<2x32xf32>
    %287 = math.exp %286 : vector<2x32xf32>
    %cst_75 = arith.constant 1.000000e+00 : f32
    %288 = vector.broadcast %cst_75 : f32 to vector<2x32xf32>
    %289 = arith.addf %288, %287 : vector<2x32xf32>
    %290 = arith.divf %288, %289 : vector<2x32xf32>
    %291 = vector.extract_strided_slice %271 {offsets = [0, 64], sizes = [2, 32], strides = [1, 1]} : vector<2x96xf32> to vector<2x32xf32>
    %292 = vector.extract_strided_slice %274 {offsets = [0, 64], sizes = [2, 32], strides = [1, 1]} : vector<2x96xf32> to vector<2x32xf32>
    %293 = arith.mulf %282, %292 : vector<2x32xf32>
    %294 = arith.addf %291, %293 : vector<2x32xf32>
    %295 = math.tanh %294 : vector<2x32xf32>
    %cst_76 = arith.constant 1.000000e+00 : f32
    %296 = vector.broadcast %cst_76 : f32 to vector<2x32xf32>
    %297 = arith.subf %296, %290 : vector<2x32xf32>
    %298 = arith.mulf %297, %295 : vector<2x32xf32>
    %299 = arith.mulf %290, %263 : vector<2x32xf32>
    %300 = arith.addf %298, %299 : vector<2x32xf32>
    %301 = arith.truncf %300 : vector<2x32xf32> to vector<2x32xbf16>
    %c0_77 = arith.constant 0 : index
    %c7_78 = arith.constant 7 : index
    %c0_79 = arith.constant 0 : index
    %302 = vector.load %arg7[%c0_77, %c7_78, %c0_79] : memref<2x8x32xbf16, #tpu.memory_space<vmem>>, vector<2x1x32xbf16>
    %303 = vector.shape_cast %302 : vector<2x1x32xbf16> to vector<2x32xbf16>
    %304 = vector.shape_cast %301 : vector<2x32xbf16> to vector<2x1x32xbf16>
    tpu.vector_store %arg7[%c0_77, %c7_78, %c0_79], %304 {strides = array<i32>} : memref<2x8x32xbf16, #tpu.memory_space<vmem>>, vector<2x1x32xbf16>,
    %c0_80 = arith.constant 0 : index
    %c0_81 = arith.constant 0 : index
    %305 = vector.load %arg9[%c0_80, %c0_81] : memref<2x32xf32, #tpu.memory_space<vmem>>, vector<2x32xf32>
    tpu.vector_store %arg9[%c0_80, %c0_81], %300 {strides = array<i32>} : memref<2x32xf32, #tpu.memory_space<vmem>>, vector<2x32xf32>,
    %c0_i32_82 = arith.constant 0 : i32
    %306 = arith.cmpi eq, %arg1, %c0_i32_82 : i32
    %307 = arith.extui %306 : i1 to i32
    %c0_i32_83 = arith.constant 0 : i32
    %308 = arith.cmpi ne, %307, %c0_i32_83 : i32
    scf.if %308 {
      %c0_84 = arith.constant 0 : index
      %c0_85 = arith.constant 0 : index
      %309 = vector.load %arg8[%c0_84, %c0_85] : memref<2x32xf32, #tpu.memory_space<vmem>>, vector<2x32xf32>
      tpu.vector_store %arg8[%c0_84, %c0_85], %300 {strides = array<i32>} : memref<2x32xf32, #tpu.memory_space<vmem>>, vector<2x32xf32>,
    } else {
    }
    return
  }
  func.func @transform_0(%arg0: i32, %arg1: i32) -> (i32, i32, i32) {
    %c0_i32 = arith.constant 0 : i32
    %c0_i32_0 = arith.constant 0 : i32
    return %arg1, %arg0, %c0_i32 : i32, i32, i32
  }
  func.func @transform_1(%arg0: i32, %arg1: i32) -> (i32, i32) {
    %c0_i32 = arith.constant 0 : i32
    %c0_i32_0 = arith.constant 0 : i32
    return %arg0, %c0_i32 : i32, i32
  }
  func.func @transform_2(%arg0: i32, %arg1: i32) -> (i32, i32) {
    %c0_i32 = arith.constant 0 : i32
    %c0_i32_0 = arith.constant 0 : i32
    %c0_i32_1 = arith.constant 0 : i32
    return %c0_i32, %c0_i32_0 : i32, i32
  }
  func.func @transform_3(%arg0: i32, %arg1: i32) -> (i32, i32) {
    %c0_i32 = arith.constant 0 : i32
    %c0_i32_0 = arith.constant 0 : i32
    %c0_i32_1 = arith.constant 0 : i32
    return %c0_i32, %c0_i32_0 : i32, i32
  }
  func.func @transform_4(%arg0: i32, %arg1: i32) -> (i32, i32) {
    %c0_i32 = arith.constant 0 : i32
    %c0_i32_0 = arith.constant 0 : i32
    %c0_i32_1 = arith.constant 0 : i32
    return %c0_i32, %c0_i32_0 : i32, i32
  }
  func.func @transform_5(%arg0: i32, %arg1: i32) -> (i32, i32, i32) {
    %c0_i32 = arith.constant 0 : i32
    %c0_i32_0 = arith.constant 0 : i32
    return %arg0, %arg1, %c0_i32 : i32, i32, i32
  }
  func.func @transform_6(%arg0: i32, %arg1: i32) -> (i32, i32) {
    %c0_i32 = arith.constant 0 : i32
    %c0_i32_0 = arith.constant 0 : i32
    return %arg0, %c0_i32 : i32, i32
  }
}

</mosaic_0001>

<bundles_post_ra>
// kernel: encoder_decoder_forward.9
= control target key start
LH: loop header
LB: loop body
LE: loop exit
PB: predicated region body
PF: predicated region fallthrough
CT: control target
= control target key end

     0   :  { %v156_v1 = vmov 0.0   ;;  %vm157_vm0 = vmmov 0   ;;  %s196_s0 = inlined_call_operand.vmem [shape: bf16[16,32], index: 0, kind: input, shape index: {}]   ;;  %s197_s1 = inlined_call_operand.vmem [shape: bf16[32,16], index: 1, kind: input, shape index: {}]   ;;  %s198_s2 = inlined_call_operand.vmem [shape: f32[1,16], index: 2, kind: input, shape index: {}]   ;;  %s199_s3 = inlined_call_operand.hbm [shape: f32[16,16], index: 3, kind: output, shape index: {}]  }
   0x1   :  { %v131_v0 = vld [vmem:[%s197_s1 + $0x8] sm:$0xff]   ;;  %118 = vmatprep.subr.bf16.mxu0 %v156_v1  ;;  %v132_v2 = vld [vmem:[%s197_s1] sm:$0xff]   ;;  %122 = vmatprep.mubr.msk.bf16.mxu0 %vm157_vm0, %v156_v1 }
   0x2   :  { %119 = vmatpush3.bf16.msra.mxu0 %v131_v0 }
   0x3   :  { %120 = vmatprep.subr.bf16.mxu0 %v156_v1 }
   0x4   :  { %8 = vsyncpa [#allocation3], 0  ;;  %v133_v3 = vld [vmem:[%s196_s0] sm:$0xff]   ;;  %vm46_vm1 = vcmask 261120   ;;  %vm91_vm2 = vcmask 130048   ;;  %s158_s20 = smov [#allocation2]  }
   0x5   :  { %v110_v4 = vld [vmem:[%s198_s2] ss:$0 sm:$0xff]  ;;  %s99_s1 = sshll.u32 %s158_s20, 4  ;;  %s100_s1 = int_to_ptr.vmem [resolvable:$true] %s99_s1 }
   0x6   :  { %121 = vmatpush3.bf16.msra.mxu0 %v132_v2  ;;  %s134_s0 = scalar_lea.vmem %s100_s1, 256  ;;  %p139_p1 = scmp.lt.s32.totalorder %s100_s1, %s100_s1 }
   0x7   :  { %p135_p0 = scmp.ne.s32.totalorder %s100_s1, %s134_s0  ;;  %p140_p2 = scmp.lt.s32.totalorder %s134_s0, %s134_s0 }
   0x9   :  { %123 = vmatmul.mubr.msk.bf16.vlgmr.msra.gmra.mxu0 %vm46_vm1, %v133_v3  ;;  %p141_p3 = por %p140_p2, %p139_p1 }
   0xb   :  { %p142_p4 = pnand %p141_p3, %p135_p0 }
  0xc9   :  { %v84_v5 = vpop.f32.mrf.mxu0 }
  0xca   :  { %v85_v6 = vadd.f32 %v110_v4, %v84_v5 }
  0xcb   :  { %v124_v7 = vpop.f32.mrf.mxu0 }
  0xcc   :  { %92 = vst.msk [vmem:[#allocation2] sm:$0xff] %vm91_vm2, %v85_v6 }
  0xcd   :  { %v87_v8 = vpop.f32.mrf.mxu0 }
  0xce   :  { %v88_v9 = vadd.f32 %v110_v4, %v87_v8 }
  0xcf   :  { %v125_v10 = vpop.f32.mrf.mxu0 }
  0xd0   :  { %93 = vst.msk [vmem:[#allocation2 + $0x8] sm:$0xff] %vm91_vm2, %v88_v9 }
  0xd1   :  { %145 = shalt.err (!%p142_p4)
}
  0xd2   :  { %s159_s2 = smov 128   ;;  %s160_s21 = smov 8  }
  0xd3   :  { %105 = dma.vmem_to_hbm [thread:$0]  %s100_s1, 256, %s199_s3, [#allocation3], %s159_s2, %s159_s2, %s160_s21  }
  0xd4   :  { %154 = dma.done.wait [#allocation3], 256  }
  0xd5   :  { %155 = vsyncadd [#allocation3], 4294967040 }
  0xd6   :  { %109 = vsyncpa [#allocation3], 1 }

// kernel: encoder_decoder_forward.5
= control target key start
LH: loop header
LB: loop body
LE: loop exit
PB: predicated region body
PF: predicated region fallthrough
CT: control target
= control target key end

     0   :  { %vm34_vm0 = vcmask 1043456   ;;  %v112_v0 = vmov 0.0   ;;  %vm113_vm1 = vmmov 0   ;;  %vm30_vm2 = vcmask 64512   ;;  %s149_s1 = inlined_call_operand.vmem [shape: bf16[8,96], index: 1, kind: input, shape index: {}]   ;;  %s150_s0 = inlined_call_operand.vmem [shape: bf16[16,8], index: 0, kind: input, shape index: {}]   ;;  %s151_s2 = inlined_call_operand.vmem [shape: f32[1,96], index: 2, kind: input, shape index: {}]   ;;  %s152_s3 = inlined_call_operand.vmem [shape: bf16[16,96], index: 3, kind: output, shape index: {}]  }
   0x1   :  { %103 = vmatprep.subr.bf16.mxu0 %v112_v0  ;;  %v17_v1 = vld [vmem:[%s149_s1] sm:$0xf]  ;;  %105 = vmatprep.mubr.msk.bf16.mxu0 %vm113_vm1, %v112_v0  ;;  %vm87_vm3 = vcmask 781312  }
   0x2   :  { %v36_v2 = vsel %vm34_vm0, %v17_v1, 0  ;;  %v111_v3 = vld [vmem:[%s150_s0] sm:$0xff]  }
   0x3   :  { %104 = vmatpush3.bf16.msra.mxu0 %v36_v2  ;;  %v94_v4 = vld [vmem:[%s151_s2] ss:$0 sm:$0xff] }
   0x6   :  { %106 = vmatmul.mubr.msk.bf16.vlgmr.msra.gmra.mxu0 %vm30_vm2, %v111_v3 }
  0xc6   :  { %v72_v5 = vpop.f32.mrf.mxu0 }
  0xc7   :  { %v73_v6 = vadd.f32 %v94_v4, %v72_v5 }
  0xc8   :  { %v107_v7 = vpop.f32.mrf.mxu0 }
  0xc9   :  { %v99_v8 = vpack.c.bf16 %v73_v6, %v73_v6 }
  0xca   :  { %v75_v9 = vpop.f32.mrf.mxu0 }
  0xcb   :  { %88 = vst.msk [vmem:[%s152_s3] sm:$0xf] %vm87_vm3, %v99_v8  ;;  %v76_v10 = vadd.f32 %v94_v4, %v75_v9 }
  0xcc   :  { %v108_v11 = vpop.f32.mrf.mxu0 }
  0xcd   :  { %v100_v12 = vpack.c.bf16 %v76_v10, %v76_v10 }
  0xcf   :  { %89 = vst.msk [vmem:[%s152_s3 + $0x4] sm:$0xf] %vm87_vm3, %v100_v12 }

// kernel: encoder_decoder_forward.6
= control target key start
LH: loop header
LB: loop body
LE: loop exit
PB: predicated region body
PF: predicated region fallthrough
CT: control target
= control target key end

     0   :  { %vm19_vm0 = vcmask 254976   ;;  %v908_v0 = vmov 0.0   ;;  %vm909_vm1 = vmmov 0   ;;  %vm48_vm2 = vcmask 261120   ;;  %s911_s17 = smov 64   ;;  %s913_s20 = smov 32   ;;  %s1088_s1 = inlined_call_operand.vmem [shape: bf16[32,96], index: 1, kind: input, shape index: {}]   ;;  %s1089_s2 = inlined_call_operand.vmem [shape: f32[1,96], index: 2, kind: input, shape index: {}]   ;;  %s1090_s0 = inlined_call_operand.vmem [shape: bf16[8,2,96], index: 0, kind: input, shape index: {}]   ;;  %s1091_s3 = inlined_call_operand.vmem [shape: f32[2,32], index: 3, kind: output, shape index: {}]  }
   0x1   :  { %788 = vmatprep.subr.bf16.mxu0 %v908_v0  ;;  %v938_v1 = vld [vmem:[%s1088_s1 + $0x8] sm:$0xff]   ;;  %792 = vmatprep.mubr.msk.bf16.mxu0 %vm909_vm1, %v908_v0  ;;  %20 = vst.msk [vmem:[#allocation2] sm:$0x3] %vm19_vm0, %v908_v0  ;;  %v951_v2 = vld [vmem:[%s1088_s1] sm:$0xff]   ;;  %v910_v5 = vmov 1983009808   ;;  %v103_v7 = vlaneseq }
   0x2   :  { %796 = vmatprep.subr.bf16.mxu1 %v908_v0  ;;  %800 = vmatprep.mubr.msk.bf16.mxu1 %vm909_vm1, %v908_v0  ;;  %v101_v6 = vunpack.c.l.s4 %v910_v5  ;;  %v970_v10 = vld [vmem:[%s1089_s2] ss:$0 sm:$0xff]  ;;  %s912_s2 = smov 96   ;;  %v743_v45 = vld [vmem:[%s1090_s0 + $0x1] sm:$0x1] }
   0x3   :  { %789 = vmatpush3.bf16.msra.mxu0 %v938_v1  ;;  %797 = vmatpush3.bf16.msra.mxu1 %v938_v1  ;;  %v104_v9 = vshrl.u32 %v103_v7, 7  ;;  %v33_v18 = vld [vmem:[%s1090_s0] sm:$0x1]  ;;  %v138_v46 = vunpack.c.l.bf16 %v743_v45 }
   0x4   :  { %790 = vmatprep.subr.bf16.mxu0 %v908_v0  ;;  %798 = vmatprep.subr.bf16.mxu1 %v908_v0  ;;  %v102_v8 = vunpack.c.0.s8 %v101_v6  ;;  %v34_v19 = vunpack.c.l.bf16 %v33_v18 }
   0x6   :  { %v972_v11 = vsub.s32 %v102_v8, %v104_v9  ;;  %v746_v9 = vld [vmem:[%s1090_s0 + $0x2] sm:$0x1] }
   0x7   :  { %791 = vmatpush3.bf16.msra.mxu0 %v951_v2  ;;  %799 = vmatpush3.bf16.msra.mxu1 %v951_v2 }
   0x8   :  { %v32_v3 = vld [vmem:[#allocation2] sm:$0x3]  ;;  %804 = vmatprep.subr.bf16.mxu0 %v908_v0  ;;  %812 = vmatprep.subr.bf16.mxu1 %v908_v0 }
   0x9   :  { %v35_v4 = vpack.c.bf16 %v32_v3, %v32_v3  ;;  %v130_v30 = vrot.slane %v32_v3, %v972_v11 }
   0xb   :  { %793 = vmatmul.mubr.msk.bf16.vlgmr.msra.gmra.mxu0 %vm48_vm2, %v35_v4 }
   0xc   :  { %805 = vmatpush3.bf16.msra.mxu0 %v938_v1  ;;  %808 = vmatprep.mubr.msk.bf16.mxu0 %vm909_vm1, %v908_v0 }
   0xd   :  { %806 = vmatprep.subr.bf16.mxu0 %v908_v0 }
  0x10   :  { %807 = vmatpush3.bf16.msra.mxu0 %v951_v2 }
  0x11   :  { %820 = vmatprep.subr.bf16.mxu0 %v908_v0 }
  0xcb   :  { %v86_v12 = vpop.f32.mrf.mxu0 }
  0xcc   :  { %v87_v13 = vadd.f32 %v970_v10, %v86_v12  ;;  %v221_v12 = vunpack.c.l.bf16 %v746_v9 }
  0xcd   :  { %v794_v14 = vpop.f32.mrf.mxu0 }
  0xce   :  { %v106_v15 = vrot.slane %v87_v13, %v972_v11  ;;  %v92_v20 = vadd.f32 %v87_v13, %v34_v19 }
  0xcf   :  { %v89_v16 = vpop.f32.mrf.mxu0 }
  0xd0   :  { %107 = vrot.lane.b32.xlu0 %v106_v15, %s911_s17  ;;  %v742_v21 = vmul.f32 -1.442695, %v92_v20 }
  0xd1   :  { %v795_v17 = vpop.f32.mrf.mxu0 }
  0xd2   :  { %860 = vpow2.f32 %v742_v21 }
  0xdf   :  { %v861_v22 = vpop.eup %860 }
  0xe0   :  { %v96_v23 = vadd.f32 1.0, %v861_v22 }
  0xe2   :  { %862 = vrcp.f32 %v96_v23 }
  0xef   :  { %v863_v24 = vpop.eup %862 }
  0xf0   :  { %v117_v32 = vsub.f32 1.0, %v863_v24 }
 0x142   :  { %v108_v25 = vpop.permute.xlu0 %107 }
 0x143   :  { %v110_v26 = vmul.f32 %v863_v24, %v108_v25 }
 0x145   :  { %112 = vrot.lane.b32.xlu0 %v110_v26, %s911_s17 }
 0x1b7   :  { %v113_v27 = vpop.permute.xlu0 %112 }
 0x1b8   :  { %v115_v28 = vadd.f32 %v113_v27, %v34_v19 }
 0x1ba   :  { %864 = vtanh.f32 %v115_v28 }
 0x1c7   :  { %v865_v29 = vpop.eup %864 }
 0x1c8   :  { %119 = vrot.lane.b32.xlu1 %v865_v29, %s912_s2 }
 0x1cc   :  { %131 = vrot.lane.b32.xlu1 %v130_v30, %s913_s20 }
 0x23a   :  { %v120_v31 = vpop.permute.xlu1 %119 }
 0x23b   :  { %v122_v34 = vmul.f32 %v120_v31, %v117_v32 }
 0x23e   :  { %v132_v33 = vpop.permute.xlu1 %131 }
 0x23f   :  { %v134_v35 = vmul.f32 %v863_v24, %v132_v33 }
 0x241   :  { %v135_v36 = vadd.f32 %v134_v35, %v122_v34 }
 0x243   :  { %v139_v37 = vpack.c.bf16 %v135_v36, %v135_v36 }
 0x245   :  { %141 = vrot.lane.b32.xlu0 %v139_v37, %s912_s2 }
 0x2b7   :  { %v142_v38 = vpop.permute.xlu0 %141 }
 0x2b8   :  { %801 = vmatmul.mubr.msk.bf16.vlgmr.msra.gmra.mxu1 %vm48_vm2, %v142_v38 }
 0x2b9   :  { %813 = vmatpush3.bf16.msra.mxu1 %v938_v1  ;;  %816 = vmatprep.mubr.msk.bf16.mxu1 %vm909_vm1, %v908_v0 }
 0x2ba   :  { %814 = vmatprep.subr.bf16.mxu1 %v908_v0 }
 0x2bd   :  { %815 = vmatpush3.bf16.msra.mxu1 %v951_v2 }
 0x2be   :  { %828 = vmatprep.subr.bf16.mxu1 %v908_v0 }
 0x378   :  { %v180_v39 = vpop.f32.mrf.mxu1 }
 0x379   :  { %v181_v40 = vadd.f32 %v970_v10, %v180_v39 }
 0x37a   :  { %v802_v41 = vpop.f32.mrf.mxu1 }
 0x37b   :  { %v200_v42 = vrot.slane %v181_v40, %v972_v11  ;;  %v186_v47 = vadd.f32 %v181_v40, %v138_v46 }
 0x37c   :  { %v183_v43 = vpop.f32.mrf.mxu1 }
 0x37d   :  { %201 = vrot.lane.b32.xlu1 %v200_v42, %s911_s17  ;;  %v745_v48 = vmul.f32 -1.442695, %v186_v47 }
 0x37e   :  { %v803_v44 = vpop.f32.mrf.mxu1 }
 0x37f   :  { %866 = vpow2.f32 %v745_v48 }
 0x38c   :  { %v867_v49 = vpop.eup %866 }
 0x38d   :  { %v190_v50 = vadd.f32 1.0, %v867_v49 }
 0x38f   :  { %868 = vrcp.f32 %v190_v50 }
 0x39c   :  { %v869_v51 = vpop.eup %868 }
 0x39d   :  { %v211_v57 = vsub.f32 1.0, %v869_v51  ;;  %v217_v59 = vmul.f32 %v869_v51, %v135_v36  ;;  %v749_v36 = vld [vmem:[%s1090_s0 + $0x3] sm:$0x1] }
 0x39e   :  { %v304_v37 = vunpack.c.l.bf16 %v749_v36 }
 0x3ef   :  { %v202_v52 = vpop.permute.xlu1 %201 }
 0x3f0   :  { %v204_v53 = vmul.f32 %v869_v51, %v202_v52 }
 0x3f2   :  { %206 = vrot.lane.b32.xlu0 %v204_v53, %s911_s17 }
 0x464   :  { %v207_v54 = vpop.permute.xlu0 %206 }
 0x465   :  { %v209_v55 = vadd.f32 %v207_v54, %v138_v46 }
 0x467   :  { %870 = vtanh.f32 %v209_v55 }
 0x474   :  { %v871_v56 = vpop.eup %870 }
 0x475   :  { %213 = vrot.lane.b32.xlu1 %v871_v56, %s912_s2 }
 0x4e7   :  { %v214_v58 = vpop.permute.xlu1 %213 }
 0x4e8   :  { %v216_v60 = vmul.f32 %v214_v58, %v211_v57 }
 0x4ea   :  { %v218_v61 = vadd.f32 %v217_v59, %v216_v60 }
 0x4ec   :  { %v222_v62 = vpack.c.bf16 %v218_v61, %v218_v61 }
 0x4ee   :  { %224 = vrot.lane.b32.xlu0 %v222_v62, %s912_s2 }
 0x560   :  { %v225_v63 = vpop.permute.xlu0 %224 }
 0x561   :  { %809 = vmatmul.mubr.msk.bf16.vlgmr.msra.gmra.mxu0 %vm48_vm2, %v225_v63 }
 0x562   :  { %821 = vmatpush3.bf16.msra.mxu0 %v938_v1  ;;  %824 = vmatprep.mubr.msk.bf16.mxu0 %vm909_vm1, %v908_v0 }
 0x563   :  { %822 = vmatprep.subr.bf16.mxu0 %v908_v0 }
 0x566   :  { %823 = vmatpush3.bf16.msra.mxu0 %v951_v2 }
 0x567   :  { %836 = vmatprep.subr.bf16.mxu0 %v908_v0 }
 0x621   :  { %v263_v3 = vpop.f32.mrf.mxu0 }
 0x622   :  { %v264_v4 = vadd.f32 %v970_v10, %v263_v3 }
 0x623   :  { %v810_v5 = vpop.f32.mrf.mxu0 }
 0x624   :  { %v283_v6 = vrot.slane %v264_v4, %v972_v11  ;;  %v269_v13 = vadd.f32 %v264_v4, %v221_v12 }
 0x625   :  { %v266_v7 = vpop.f32.mrf.mxu0 }
 0x626   :  { %284 = vrot.lane.b32.xlu1 %v283_v6, %s911_s17  ;;  %v748_v14 = vmul.f32 -1.442695, %v269_v13 }
 0x627   :  { %v811_v8 = vpop.f32.mrf.mxu0 }
 0x628   :  { %872 = vpow2.f32 %v748_v14 }
 0x635   :  { %v873_v15 = vpop.eup %872 }
 0x636   :  { %v273_v16 = vadd.f32 1.0, %v873_v15 }
 0x638   :  { %874 = vrcp.f32 %v273_v16 }
 0x645   :  { %v875_v17 = vpop.eup %874 }
 0x646   :  { %v294_v23 = vsub.f32 1.0, %v875_v17  ;;  %v300_v25 = vmul.f32 %v875_v17, %v218_v61  ;;  %v752_v61 = vld [vmem:[%s1090_s0 + $0x4] sm:$0x1] }
 0x647   :  { %v387_v62 = vunpack.c.l.bf16 %v752_v61 }
 0x698   :  { %v285_v18 = vpop.permute.xlu1 %284 }
 0x699   :  { %v287_v19 = vmul.f32 %v875_v17, %v285_v18 }
 0x69b   :  { %289 = vrot.lane.b32.xlu0 %v287_v19, %s911_s17 }
 0x70d   :  { %v290_v20 = vpop.permute.xlu0 %289 }
 0x70e   :  { %v292_v21 = vadd.f32 %v290_v20, %v221_v12 }
 0x710   :  { %876 = vtanh.f32 %v292_v21 }
 0x71d   :  { %v877_v22 = vpop.eup %876 }
 0x71e   :  { %296 = vrot.lane.b32.xlu1 %v877_v22, %s912_s2 }
 0x790   :  { %v297_v24 = vpop.permute.xlu1 %296 }
 0x791   :  { %v299_v26 = vmul.f32 %v297_v24, %v294_v23 }
 0x793   :  { %v301_v27 = vadd.f32 %v300_v25, %v299_v26 }
 0x795   :  { %v305_v28 = vpack.c.bf16 %v301_v27, %v301_v27 }
 0x797   :  { %307 = vrot.lane.b32.xlu0 %v305_v28, %s912_s2 }
 0x809   :  { %v308_v29 = vpop.permute.xlu0 %307 }
 0x80a   :  { %817 = vmatmul.mubr.msk.bf16.vlgmr.msra.gmra.mxu1 %vm48_vm2, %v308_v29 }
 0x80b   :  { %829 = vmatpush3.bf16.msra.mxu1 %v938_v1  ;;  %832 = vmatprep.mubr.msk.bf16.mxu1 %vm909_vm1, %v908_v0 }
 0x80c   :  { %830 = vmatprep.subr.bf16.mxu1 %v908_v0 }
 0x80f   :  { %831 = vmatpush3.bf16.msra.mxu1 %v951_v2 }
 0x810   :  { %844 = vmatprep.subr.bf16.mxu1 %v908_v0 }
 0x8ca   :  { %v346_v30 = vpop.f32.mrf.mxu1 }
 0x8cb   :  { %v347_v31 = vadd.f32 %v970_v10, %v346_v30 }
 0x8cc   :  { %v818_v32 = vpop.f32.mrf.mxu1 }
 0x8cd   :  { %v366_v33 = vrot.slane %v347_v31, %v972_v11  ;;  %v352_v38 = vadd.f32 %v347_v31, %v304_v37 }
 0x8ce   :  { %v349_v34 = vpop.f32.mrf.mxu1 }
 0x8cf   :  { %367 = vrot.lane.b32.xlu1 %v366_v33, %s911_s17  ;;  %v751_v39 = vmul.f32 -1.442695, %v352_v38 }
 0x8d0   :  { %v819_v35 = vpop.f32.mrf.mxu1 }
 0x8d1   :  { %878 = vpow2.f32 %v751_v39 }
 0x8de   :  { %v879_v40 = vpop.eup %878 }
 0x8df   :  { %v356_v41 = vadd.f32 1.0, %v879_v40 }
 0x8e1   :  { %880 = vrcp.f32 %v356_v41 }
 0x8ee   :  { %v881_v42 = vpop.eup %880 }
 0x8ef   :  { %v377_v48 = vsub.f32 1.0, %v881_v42  ;;  %v383_v50 = vmul.f32 %v881_v42, %v301_v27 }
 0x941   :  { %v368_v43 = vpop.permute.xlu1 %367 }
 0x942   :  { %v370_v44 = vmul.f32 %v881_v42, %v368_v43 }
 0x944   :  { %372 = vrot.lane.b32.xlu0 %v370_v44, %s911_s17 }
 0x9b6   :  { %v373_v45 = vpop.permute.xlu0 %372 }
 0x9b7   :  { %v375_v46 = vadd.f32 %v373_v45, %v304_v37 }
 0x9b9   :  { %882 = vtanh.f32 %v375_v46 }
 0x9c6   :  { %v883_v47 = vpop.eup %882 }
 0x9c7   :  { %379 = vrot.lane.b32.xlu1 %v883_v47, %s912_s2 }
 0xa39   :  { %v380_v49 = vpop.permute.xlu1 %379 }
 0xa3a   :  { %v382_v51 = vmul.f32 %v380_v49, %v377_v48  ;;  %v758_v49 = vld [vmem:[%s1090_s0 + $0x6] sm:$0x1] }
 0xa3c   :  { %v384_v52 = vadd.f32 %v383_v50, %v382_v51  ;;  %v553_v50 = vunpack.c.l.bf16 %v758_v49 }
 0xa3e   :  { %v388_v53 = vpack.c.bf16 %v384_v52, %v384_v52 }
 0xa40   :  { %390 = vrot.lane.b32.xlu0 %v388_v53, %s912_s2 }
 0xab2   :  { %v391_v54 = vpop.permute.xlu0 %390 }
 0xab3   :  { %825 = vmatmul.mubr.msk.bf16.vlgmr.msra.gmra.mxu0 %vm48_vm2, %v391_v54 }
 0xab4   :  { %837 = vmatpush3.bf16.msra.mxu0 %v938_v1  ;;  %840 = vmatprep.mubr.msk.bf16.mxu0 %vm909_vm1, %v908_v0 }
 0xab5   :  { %838 = vmatprep.subr.bf16.mxu0 %v908_v0 }
 0xab8   :  { %839 = vmatpush3.bf16.msra.mxu0 %v951_v2 }
 0xb73   :  { %v429_v55 = vpop.f32.mrf.mxu0 }
 0xb74   :  { %v430_v56 = vadd.f32 %v970_v10, %v429_v55 }
 0xb75   :  { %v826_v57 = vpop.f32.mrf.mxu0 }
 0xb76   :  { %v449_v58 = vrot.slane %v430_v56, %v972_v11  ;;  %v435_v63 = vadd.f32 %v430_v56, %v387_v62 }
 0xb77   :  { %v432_v59 = vpop.f32.mrf.mxu0 }
 0xb78   :  { %450 = vrot.lane.b32.xlu1 %v449_v58, %s911_s17  ;;  %v754_v3 = vmul.f32 -1.442695, %v435_v63 }
 0xb79   :  { %v827_v60 = vpop.f32.mrf.mxu0 }
 0xb7a   :  { %884 = vpow2.f32 %v754_v3 }
 0xb87   :  { %v885_v4 = vpop.eup %884 }
 0xb88   :  { %v439_v5 = vadd.f32 1.0, %v885_v4 }
 0xb8a   :  { %886 = vrcp.f32 %v439_v5 }
 0xb97   :  { %v887_v6 = vpop.eup %886 }
 0xb98   :  { %v460_v14 = vsub.f32 1.0, %v887_v6  ;;  %v466_v16 = vmul.f32 %v887_v6, %v384_v52 }
 0xbea   :  { %v451_v7 = vpop.permute.xlu1 %450 }
 0xbeb   :  { %v453_v8 = vmul.f32 %v887_v6, %v451_v7 }
 0xbed   :  { %455 = vrot.lane.b32.xlu0 %v453_v8, %s911_s17 }
 0xc5f   :  { %v456_v9 = vpop.permute.xlu0 %455 }
 0xc60   :  { %v458_v12 = vadd.f32 %v456_v9, %v387_v62 }
 0xc62   :  { %888 = vtanh.f32 %v458_v12 }
 0xc6f   :  { %v889_v13 = vpop.eup %888 }
 0xc70   :  { %462 = vrot.lane.b32.xlu1 %v889_v13, %s912_s2 }
 0xce2   :  { %v463_v15 = vpop.permute.xlu1 %462 }
 0xce3   :  { %v465_v17 = vmul.f32 %v463_v15, %v460_v14  ;;  %v761_v15 = vld [vmem:[%s1090_s0 + $0x7] sm:$0x1] }
 0xce5   :  { %v467_v18 = vadd.f32 %v466_v16, %v465_v17  ;;  %v636_v16 = vunpack.c.l.bf16 %v761_v15 }
 0xce7   :  { %v471_v19 = vpack.c.bf16 %v467_v18, %v467_v18 }
 0xce9   :  { %473 = vrot.lane.b32.xlu0 %v471_v19, %s912_s2 }
 0xd5b   :  { %v474_v20 = vpop.permute.xlu0 %473 }
 0xd5c   :  { %833 = vmatmul.mubr.msk.bf16.vlgmr.msra.gmra.mxu1 %vm48_vm2, %v474_v20 }
 0xd5d   :  { %845 = vmatpush3.bf16.msra.mxu1 %v938_v1  ;;  %848 = vmatprep.mubr.msk.bf16.mxu1 %vm909_vm1, %v908_v0  ;;  %v755_v1 = vld [vmem:[%s1090_s0 + $0x5] sm:$0x1] }
 0xd5e   :  { %846 = vmatprep.subr.bf16.mxu1 %v908_v0  ;;  %v470_v27 = vunpack.c.l.bf16 %v755_v1 }
 0xd61   :  { %847 = vmatpush3.bf16.msra.mxu1 %v951_v2 }
 0xe1c   :  { %v512_v21 = vpop.f32.mrf.mxu1 }
 0xe1d   :  { %v513_v22 = vadd.f32 %v970_v10, %v512_v21 }
 0xe1e   :  { %v834_v23 = vpop.f32.mrf.mxu1 }
 0xe1f   :  { %v532_v24 = vrot.slane %v513_v22, %v972_v11  ;;  %v518_v28 = vadd.f32 %v513_v22, %v470_v27 }
 0xe20   :  { %v515_v25 = vpop.f32.mrf.mxu1 }
 0xe21   :  { %533 = vrot.lane.b32.xlu1 %v532_v24, %s911_s17  ;;  %v757_v29 = vmul.f32 -1.442695, %v518_v28 }
 0xe22   :  { %v835_v26 = vpop.f32.mrf.mxu1 }
 0xe23   :  { %890 = vpow2.f32 %v757_v29 }
 0xe30   :  { %v891_v0 = vpop.eup %890 }
 0xe31   :  { %v522_v2 = vadd.f32 1.0, %v891_v0 }
 0xe33   :  { %892 = vrcp.f32 %v522_v2 }
 0xe40   :  { %v893_v30 = vpop.eup %892 }
 0xe41   :  { %v543_v36 = vsub.f32 1.0, %v893_v30  ;;  %v549_v38 = vmul.f32 %v893_v30, %v467_v18 }
 0xe93   :  { %v534_v31 = vpop.permute.xlu1 %533 }
 0xe94   :  { %v536_v32 = vmul.f32 %v893_v30, %v534_v31 }
 0xe96   :  { %538 = vrot.lane.b32.xlu0 %v536_v32, %s911_s17 }
 0xf08   :  { %v539_v33 = vpop.permute.xlu0 %538 }
 0xf09   :  { %v541_v34 = vadd.f32 %v539_v33, %v470_v27 }
 0xf0b   :  { %894 = vtanh.f32 %v541_v34 }
 0xf18   :  { %v895_v35 = vpop.eup %894 }
 0xf19   :  { %545 = vrot.lane.b32.xlu1 %v895_v35, %s912_s2 }
 0xf8b   :  { %v546_v37 = vpop.permute.xlu1 %545 }
 0xf8c   :  { %v548_v39 = vmul.f32 %v546_v37, %v543_v36 }
 0xf8e   :  { %v550_v40 = vadd.f32 %v549_v38, %v548_v39 }
 0xf90   :  { %v554_v41 = vpack.c.bf16 %v550_v40, %v550_v40 }
 0xf92   :  { %556 = vrot.lane.b32.xlu0 %v554_v41, %s912_s2 }
0x1004   :  { %v557_v42 = vpop.permute.xlu0 %556 }
0x1005   :  { %841 = vmatmul.mubr.msk.bf16.vlgmr.msra.gmra.mxu0 %vm48_vm2, %v557_v42 }
0x10c5   :  { %v595_v43 = vpop.f32.mrf.mxu0 }
0x10c6   :  { %v596_v44 = vadd.f32 %v970_v10, %v595_v43 }
0x10c7   :  { %v842_v45 = vpop.f32.mrf.mxu0 }
0x10c8   :  { %v615_v46 = vrot.slane %v596_v44, %v972_v11  ;;  %v601_v51 = vadd.f32 %v596_v44, %v553_v50 }
0x10c9   :  { %v598_v47 = vpop.f32.mrf.mxu0 }
0x10ca   :  { %616 = vrot.lane.b32.xlu1 %v615_v46, %s911_s17  ;;  %v760_v52 = vmul.f32 -1.442695, %v601_v51 }
0x10cb   :  { %v843_v48 = vpop.f32.mrf.mxu0 }
0x10cc   :  { %896 = vpow2.f32 %v760_v52 }
0x10d9   :  { %v897_v53 = vpop.eup %896 }
0x10da   :  { %v605_v54 = vadd.f32 1.0, %v897_v53 }
0x10dc   :  { %898 = vrcp.f32 %v605_v54 }
0x10e9   :  { %v899_v55 = vpop.eup %898 }
0x10ea   :  { %v626_v61 = vsub.f32 1.0, %v899_v55  ;;  %v632_v63 = vmul.f32 %v899_v55, %v550_v40 }
0x113c   :  { %v617_v56 = vpop.permute.xlu1 %616 }
0x113d   :  { %v619_v57 = vmul.f32 %v899_v55, %v617_v56 }
0x113f   :  { %621 = vrot.lane.b32.xlu0 %v619_v57, %s911_s17 }
0x11b1   :  { %v622_v58 = vpop.permute.xlu0 %621 }
0x11b2   :  { %v624_v59 = vadd.f32 %v622_v58, %v553_v50 }
0x11b4   :  { %900 = vtanh.f32 %v624_v59 }
0x11c1   :  { %v901_v60 = vpop.eup %900 }
0x11c2   :  { %628 = vrot.lane.b32.xlu1 %v901_v60, %s912_s2 }
0x1234   :  { %v629_v62 = vpop.permute.xlu1 %628 }
0x1235   :  { %v631_v3 = vmul.f32 %v629_v62, %v626_v61 }
0x1237   :  { %v633_v4 = vadd.f32 %v632_v63, %v631_v3 }
0x1239   :  { %v637_v5 = vpack.c.bf16 %v633_v4, %v633_v4 }
0x123b   :  { %639 = vrot.lane.b32.xlu0 %v637_v5, %s912_s2 }
0x12ad   :  { %v640_v6 = vpop.permute.xlu0 %639 }
0x12ae   :  { %849 = vmatmul.mubr.msk.bf16.vlgmr.msra.gmra.mxu1 %vm48_vm2, %v640_v6 }
0x136e   :  { %v678_v7 = vpop.f32.mrf.mxu1 }
0x136f   :  { %v679_v8 = vadd.f32 %v970_v10, %v678_v7 }
0x1370   :  { %v850_v9 = vpop.f32.mrf.mxu1 }
0x1371   :  { %v698_v12 = vrot.slane %v679_v8, %v972_v11  ;;  %v684_v17 = vadd.f32 %v679_v8, %v636_v16 }
0x1372   :  { %v681_v13 = vpop.f32.mrf.mxu1 }
0x1373   :  { %699 = vrot.lane.b32.xlu1 %v698_v12, %s911_s17  ;;  %v763_v18 = vmul.f32 -1.442695, %v684_v17 }
0x1374   :  { %v851_v14 = vpop.f32.mrf.mxu1 }
0x1375   :  { %902 = vpow2.f32 %v763_v18 }
0x1382   :  { %v903_v19 = vpop.eup %902 }
0x1383   :  { %v688_v20 = vadd.f32 1.0, %v903_v19 }
0x1385   :  { %904 = vrcp.f32 %v688_v20 }
0x1392   :  { %v905_v21 = vpop.eup %904 }
0x1393   :  { %v709_v26 = vsub.f32 1.0, %v905_v21  ;;  %v715_v27 = vmul.f32 %v905_v21, %v633_v4 }
0x13e5   :  { %v700_v10 = vpop.permute.xlu1 %699 }
0x13e6   :  { %v702_v22 = vmul.f32 %v905_v21, %v700_v10 }
0x13e8   :  { %704 = vrot.lane.b32.xlu0 %v702_v22, %s911_s17 }
0x145a   :  { %v705_v23 = vpop.permute.xlu0 %704 }
0x145b   :  { %v707_v24 = vadd.f32 %v705_v23, %v636_v16 }
0x145d   :  { %906 = vtanh.f32 %v707_v24 }
0x146a   :  { %v907_v25 = vpop.eup %906 }
0x146b   :  { %711 = vrot.lane.b32.xlu1 %v907_v25, %s912_s2 }
0x14dd   :  { %v712_v1 = vpop.permute.xlu1 %711 }
0x14de   :  { %v714_v28 = vmul.f32 %v712_v1, %v709_v26 }
0x14e0   :  { %v716_v29 = vadd.f32 %v715_v27, %v714_v28 }
0x14e2   :  { %v724_v0 = vrot.slane %v716_v29, %v972_v11 }
0x14e4   :  { %725 = vrot.lane.b32.xlu0 %v724_v0, %s912_s2 }
0x1556   :  { %v726_v2 = vpop.permute.xlu0 %725 }
0x1557   :  { %729 = vst.msk [vmem:[#allocation2] sm:$0x3] %vm19_vm0, %v726_v2  ;;  %733 = vst.msk [vmem:[%s1091_s3] sm:$0x3] %vm19_vm0, %v726_v2 }

// kernel: encoder_decoder_forward.8
= control target key start
LH: loop header
LB: loop body
LE: loop exit
PB: predicated region body
PF: predicated region fallthrough
CT: control target
= control target key end

     0   :  { %v1427_v1 = vmov 0.0   ;;  %vm1428_vm0 = vmmov 0   ;;  %vm29_vm1 = vcmask 254976   ;;  %s1934_s0 = inlined_call_operand.vmem [shape: bf16[8,2,96], index: 0, kind: input, shape index: {}]   ;;  %s1935_s1 = inlined_call_operand.vmem [shape: f32[2,32], index: 1, kind: input, shape index: {}]   ;;  %s1936_s2 = inlined_call_operand.vmem [shape: bf16[32,96], index: 2, kind: input, shape index: {}]   ;;  %s1937_s3 = inlined_call_operand.vmem [shape: bf16[32,96], index: 3, kind: input, shape index: {}]   ;;  %s1938_s4 = inlined_call_operand.vmem [shape: f32[1,96], index: 4, kind: input, shape index: {}]   ;;  %s1939_s5 = inlined_call_operand.vmem [shape: bf16[2,8,32], index: 5, kind: output, shape index: {0}]   ;;  %s1940_s6 = inlined_call_operand.hbm [shape: f32[2,32], index: 6, kind: output, shape index: {1}]  }
   0x1   :  { %v1353_v0 = vld [vmem:[%s1936_s2 + $0x8] sm:$0xff]   ;;  %1272 = vmatprep.subr.bf16.mxu0 %v1427_v1  ;;  %1280 = vmatprep.subr.bf16.mxu1 %v1427_v1  ;;  %v1355_v3 = vld [vmem:[%s1936_s2] sm:$0xff]  }
   0x2   :  { %v1479_v2 = vld [vmem:[%s1937_s3 + $0x8] sm:$0xff]   ;;  %1273 = vmatpush3.bf16.msra.mxu0 %v1353_v0  ;;  %1276 = vmatprep.mubr.msk.bf16.mxu0 %vm1428_vm0, %v1427_v1  ;;  %v1491_v4 = vld [vmem:[%s1937_s3] sm:$0xff]  }
   0x3   :  { %1281 = vmatpush3.bf16.msra.mxu1 %v1479_v2  ;;  %1274 = vmatprep.subr.bf16.mxu0 %v1427_v1  ;;  %v28_v5 = vld [vmem:[%s1935_s1] sm:$0x3] }
   0x4   :  { %1282 = vmatprep.subr.bf16.mxu1 %v1427_v1  ;;  %1284 = vmatprep.mubr.msk.bf16.mxu1 %vm1428_vm0, %v1427_v1 }
   0x5   :  { %12 = vsyncpa [#allocation5], 0  ;;  %30 = vst.msk [vmem:[#allocation2] sm:$0x3] %vm29_vm1, %v28_v5  ;;  %v31_v6 = vpack.c.bf16 %v28_v5, %v28_v5  ;;  %vm48_vm2 = vcmask 261120   ;;  %v178_v11 = vlaneseq  ;;  %vm92_vm3 = vcmask 779264  }
   0x6   :  { %1275 = vmatpush3.bf16.msra.mxu0 %v1355_v3  ;;  %v1429_v9 = vmov 1983009808   ;;  %v1522_v16 = vld [vmem:[%s1938_s4] ss:$0 sm:$0xff]  ;;  %s1430_s3 = smov 64   ;;  %s1431_s4 = smov 96  }
   0x7   :  { %1283 = vmatpush3.bf16.msra.mxu1 %v1491_v4  ;;  %1288 = vmatprep.subr.bf16.mxu0 %v1427_v1  ;;  %v176_v10 = vunpack.c.l.s4 %v1429_v9  ;;  %v1517_v14 = vshrl.u32 %v178_v11, 7  ;;  %v107_v26 = vld [vmem:[%s1934_s0] sm:$0x1]  ;;  %s1432_s9 = smov 32   ;;  %v1217_v55 = vld [vmem:[%s1934_s0 + $0x1] sm:$0x1] }
   0x8   :  { %1296 = vmatprep.subr.bf16.mxu1 %v1427_v1  ;;  %v108_v27 = vunpack.c.l.bf16 %v107_v26  ;;  %v262_v56 = vunpack.c.l.bf16 %v1217_v55  ;;  %vm251_vm4 = vcmask 253952   ;;  %vm252_vm5 = vsmask.f32 256  ;;  %s1435_s24 = smov [#allocation4]  }
   0x9   :  { %1277 = vmatmul.mubr.msk.bf16.vlgmr.msra.gmra.mxu0 %vm48_vm2, %v31_v6  ;;  %v177_v13 = vunpack.c.0.s8 %v176_v10  ;;  %vm1737_vm6 = vmand %vm251_vm4, %vm252_vm5  ;;  %vm512_vm7 = vcmask 254977   ;;  %vm513_vm8 = vsmask.f32 1280  ;;  %vm773_vm10 = vcmask 256002   ;;  %s1198_s25 = sshll.u32 %s1435_s24, 4  ;;  %s1199_s25 = int_to_ptr.vmem [resolvable:$true] %s1198_s25 }
   0xa   :  { %1289 = vmatpush3.bf16.msra.mxu0 %v1479_v2  ;;  %1292 = vmatprep.mubr.msk.bf16.mxu0 %vm1428_vm0, %v1427_v1  ;;  %vm1750_vm9 = vmand %vm512_vm7, %vm513_vm8  ;;  %vm774_vm11 = vsmask.f32 2304  ;;  %vm1034_vm13 = vcmask 257027   ;;  %vm1035_vm14 = vsmask.f32 3328  ;;  %s1405_s2 = scalar_lea.vmem %s1199_s25, 32  ;;  %p1410_p1 = scmp.lt.s32.totalorder %s1199_s25, %s1199_s25 }
   0xb   :  { %1290 = vmatprep.subr.bf16.mxu0 %v1427_v1  ;;  %v1525_v18 = vsub.s32 %v177_v13, %v1517_v14  ;;  %vm1763_vm12 = vmand %vm773_vm10, %vm774_vm11  ;;  %vm904_vm5 = vsmask.f32 7946  ;;  %p1406_p0 = scmp.ne.s32.totalorder %s1199_s25, %s1405_s2  ;;  %p1411_p2 = scmp.lt.s32.totalorder %s1405_s2, %s1405_s2 }
   0xc   :  { %v106_v7 = vld [vmem:[#allocation2] sm:$0x3]  ;;  %vm1777_vm15 = vmand %vm1034_vm13, %vm1035_vm14 }
   0xd   :  { %v110_v8 = vpack.c.bf16 %v106_v7, %v106_v7  ;;  %v205_v40 = vrot.slane %v106_v7, %v1525_v18  ;;  %p1412_p3 = por %p1411_p2, %p1410_p1 }
   0xe   :  { %1291 = vmatpush3.bf16.msra.mxu0 %v1491_v4 }
   0xf   :  { %1285 = vmatmul.mubr.msk.bf16.vlgmr.msra.gmra.mxu1 %vm48_vm2, %v110_v8  ;;  %1304 = vmatprep.subr.bf16.mxu0 %v1427_v1  ;;  %p1413_p4 = pnand %p1412_p3, %p1406_p0 }
  0x10   :  { %1297 = vmatpush3.bf16.msra.mxu1 %v1479_v2  ;;  %1300 = vmatprep.mubr.msk.bf16.mxu1 %vm1428_vm0, %v1427_v1 }
  0x11   :  { %1298 = vmatprep.subr.bf16.mxu1 %v1427_v1 }
  0x14   :  { %1299 = vmatpush3.bf16.msra.mxu1 %v1491_v4 }
  0x15   :  { %1312 = vmatprep.subr.bf16.mxu1 %v1427_v1 }
  0xc9   :  { %v86_v12 = vpop.f32.mrf.mxu0 }
  0xca   :  { %93 = vst.msk [vmem:[#allocation3] sm:$0x3] %vm92_vm3, %v86_v12  ;;  %vm643_vm3 = vsmask.f32 7942 }
  0xcb   :  { %v1278_v15 = vpop.f32.mrf.mxu0 }
  0xcd   :  { %v89_v17 = vpop.f32.mrf.mxu0 }
  0xcf   :  { %v161_v19 = vpop.f32.mrf.mxu1  ;;  %v1279_v20 = vpop.f32.mrf.mxu0 }
  0xd0   :  { %v162_v21 = vadd.f32 %v1522_v16, %v161_v19 }
  0xd1   :  { %v1286_v22 = vpop.f32.mrf.mxu1  ;;  %v1533_v28 = vld [vmem:[#allocation3] sm:$0x3] }
  0xd2   :  { %v181_v23 = vrot.slane %v162_v21, %v1525_v18  ;;  %v109_v29 = vadd.f32 %v108_v27, %v1533_v28  ;;  %v263_v57 = vadd.f32 %v262_v56, %v1533_v28 }
  0xd3   :  { %v164_v24 = vpop.f32.mrf.mxu1 }
  0xd4   :  { %182 = vrot.lane.b32.xlu0 %v181_v23, %s1430_s3  ;;  %v167_v30 = vadd.f32 %v162_v21, %v109_v29  ;;  %v1221_v23 = vld [vmem:[%s1934_s0 + $0x2] sm:$0x1] }
  0xd5   :  { %v1287_v25 = vpop.f32.mrf.mxu1  ;;  %v392_v24 = vunpack.c.l.bf16 %v1221_v23 }
  0xd6   :  { %v1215_v31 = vmul.f32 -1.442695, %v167_v30 }
  0xd7   :  { %v393_v25 = vadd.f32 %v392_v24, %v1533_v28 }
  0xd8   :  { %1357 = vpow2.f32 %v1215_v31 }
  0xe5   :  { %v1358_v32 = vpop.eup %1357 }
  0xe6   :  { %v171_v33 = vadd.f32 1.0, %v1358_v32 }
  0xe8   :  { %1359 = vrcp.f32 %v171_v33 }
  0xf5   :  { %v1360_v34 = vpop.eup %1359 }
  0xf6   :  { %v192_v42 = vsub.f32 1.0, %v1360_v34 }
 0x146   :  { %v183_v35 = vpop.permute.xlu0 %182 }
 0x147   :  { %v185_v36 = vmul.f32 %v1360_v34, %v183_v35 }
 0x149   :  { %187 = vrot.lane.b32.xlu0 %v185_v36, %s1430_s3 }
 0x1bb   :  { %v188_v37 = vpop.permute.xlu0 %187 }
 0x1bc   :  { %v190_v38 = vadd.f32 %v188_v37, %v109_v29 }
 0x1be   :  { %1361 = vtanh.f32 %v190_v38 }
 0x1cb   :  { %v1362_v39 = vpop.eup %1361 }
 0x1cc   :  { %194 = vrot.lane.b32.xlu1 %v1362_v39, %s1431_s4 }
 0x1d0   :  { %206 = vrot.lane.b32.xlu1 %v205_v40, %s1432_s9 }
 0x23e   :  { %v195_v41 = vpop.permute.xlu1 %194 }
 0x23f   :  { %v197_v44 = vmul.f32 %v195_v41, %v192_v42 }
 0x242   :  { %v207_v43 = vpop.permute.xlu1 %206 }
 0x243   :  { %v209_v45 = vmul.f32 %v1360_v34, %v207_v43 }
 0x245   :  { %v210_v46 = vadd.f32 %v209_v45, %v197_v44 }
 0x247   :  { %v1539_v47 = vpack.c.bf16 %v210_v46, %v210_v46 }
 0x249   :  { %264 = vrot.lane.b32.xlu0 %v1539_v47, %s1431_s4 }
 0x2bb   :  { %v265_v48 = vpop.permute.xlu0 %264 }
 0x2bc   :  { %1293 = vmatmul.mubr.msk.bf16.vlgmr.msra.gmra.mxu0 %vm48_vm2, %v265_v48 }
 0x2bd   :  { %1305 = vmatpush3.bf16.msra.mxu0 %v1479_v2  ;;  %1308 = vmatprep.mubr.msk.bf16.mxu0 %vm1428_vm0, %v1427_v1 }
 0x2be   :  { %1306 = vmatprep.subr.bf16.mxu0 %v1427_v1 }
 0x2c1   :  { %1307 = vmatpush3.bf16.msra.mxu0 %v1491_v4 }
 0x2c2   :  { %1320 = vmatprep.subr.bf16.mxu0 %v1427_v1 }
 0x37c   :  { %v303_v49 = vpop.f32.mrf.mxu0 }
 0x37d   :  { %v304_v50 = vadd.f32 %v1522_v16, %v303_v49 }
 0x37e   :  { %v1294_v51 = vpop.f32.mrf.mxu0 }
 0x37f   :  { %v323_v52 = vrot.slane %v304_v50, %v1525_v18  ;;  %v309_v58 = vadd.f32 %v304_v50, %v263_v57  ;;  %v1225_v51 = vld [vmem:[%s1934_s0 + $0x3] sm:$0x1] }
 0x380   :  { %v306_v53 = vpop.f32.mrf.mxu0 }
 0x381   :  { %324 = vrot.lane.b32.xlu1 %v323_v52, %s1430_s3  ;;  %v1219_v59 = vmul.f32 -1.442695, %v309_v58  ;;  %v523_v52 = vunpack.c.l.bf16 %v1225_v51 }
 0x382   :  { %v1295_v54 = vpop.f32.mrf.mxu0 }
 0x383   :  { %1363 = vpow2.f32 %v1219_v59  ;;  %v524_v53 = vadd.f32 %v523_v52, %v1533_v28 }
 0x390   :  { %v1364_v60 = vpop.eup %1363 }
 0x391   :  { %v313_v61 = vadd.f32 1.0, %v1364_v60 }
 0x393   :  { %1365 = vrcp.f32 %v313_v61 }
 0x3a0   :  { %v1366_v62 = vpop.eup %1365 }
 0x3a1   :  { %v334_v7 = vsub.f32 1.0, %v1366_v62  ;;  %v340_v9 = vmul.f32 %v1366_v62, %v210_v46 }
 0x3f3   :  { %v325_v63 = vpop.permute.xlu1 %324 }
 0x3f4   :  { %v327_v0 = vmul.f32 %v1366_v62, %v325_v63 }
 0x3f6   :  { %329 = vrot.lane.b32.xlu0 %v327_v0, %s1430_s3 }
 0x468   :  { %v330_v3 = vpop.permute.xlu0 %329 }
 0x469   :  { %v332_v5 = vadd.f32 %v330_v3, %v263_v57 }
 0x46b   :  { %1367 = vtanh.f32 %v332_v5 }
 0x478   :  { %v1368_v6 = vpop.eup %1367 }
 0x479   :  { %336 = vrot.lane.b32.xlu1 %v1368_v6, %s1431_s4 }
 0x4eb   :  { %v337_v8 = vpop.permute.xlu1 %336 }
 0x4ec   :  { %v339_v10 = vmul.f32 %v337_v8, %v334_v7 }
 0x4ee   :  { %v341_v11 = vadd.f32 %v340_v9, %v339_v10 }
 0x4f0   :  { %v1559_v12 = vpack.c.bf16 %v341_v11, %v341_v11 }
 0x4f2   :  { %394 = vrot.lane.b32.xlu0 %v1559_v12, %s1431_s4 }
 0x564   :  { %v395_v13 = vpop.permute.xlu0 %394 }
 0x565   :  { %1301 = vmatmul.mubr.msk.bf16.vlgmr.msra.gmra.mxu1 %vm48_vm2, %v395_v13 }
 0x566   :  { %1313 = vmatpush3.bf16.msra.mxu1 %v1479_v2  ;;  %1316 = vmatprep.mubr.msk.bf16.mxu1 %vm1428_vm0, %v1427_v1 }
 0x567   :  { %1314 = vmatprep.subr.bf16.mxu1 %v1427_v1 }
 0x56a   :  { %1315 = vmatpush3.bf16.msra.mxu1 %v1491_v4 }
 0x56b   :  { %1328 = vmatprep.subr.bf16.mxu1 %v1427_v1 }
 0x625   :  { %v433_v15 = vpop.f32.mrf.mxu1 }
 0x626   :  { %v434_v17 = vadd.f32 %v1522_v16, %v433_v15 }
 0x627   :  { %v1302_v19 = vpop.f32.mrf.mxu1 }
 0x628   :  { %v453_v20 = vrot.slane %v434_v17, %v1525_v18  ;;  %v439_v26 = vadd.f32 %v434_v17, %v393_v25 }
 0x629   :  { %v436_v21 = vpop.f32.mrf.mxu1 }
 0x62a   :  { %454 = vrot.lane.b32.xlu1 %v453_v20, %s1430_s3  ;;  %v1223_v27 = vmul.f32 -1.442695, %v439_v26  ;;  %v1229_v20 = vld [vmem:[%s1934_s0 + $0x4] sm:$0x1] }
 0x62b   :  { %v1303_v22 = vpop.f32.mrf.mxu1  ;;  %v653_v21 = vunpack.c.l.bf16 %v1229_v20 }
 0x62c   :  { %1369 = vpow2.f32 %v1223_v27 }
 0x62d   :  { %v654_v22 = vadd.f32 %v653_v21, %v1533_v28 }
 0x639   :  { %v1370_v29 = vpop.eup %1369 }
 0x63a   :  { %v443_v30 = vadd.f32 1.0, %v1370_v29 }
 0x63c   :  { %1371 = vrcp.f32 %v443_v30 }
 0x649   :  { %v1372_v31 = vpop.eup %1371 }
 0x64a   :  { %v464_v37 = vsub.f32 1.0, %v1372_v31  ;;  %v470_v39 = vmul.f32 %v1372_v31, %v341_v11 }
 0x69c   :  { %v455_v32 = vpop.permute.xlu1 %454 }
 0x69d   :  { %v457_v33 = vmul.f32 %v1372_v31, %v455_v32 }
 0x69f   :  { %459 = vrot.lane.b32.xlu0 %v457_v33, %s1430_s3 }
 0x711   :  { %v460_v34 = vpop.permute.xlu0 %459 }
 0x712   :  { %v462_v35 = vadd.f32 %v460_v34, %v393_v25 }
 0x714   :  { %1373 = vtanh.f32 %v462_v35 }
 0x721   :  { %v1374_v36 = vpop.eup %1373 }
 0x722   :  { %466 = vrot.lane.b32.xlu1 %v1374_v36, %s1431_s4 }
 0x794   :  { %v467_v38 = vpop.permute.xlu1 %466 }
 0x795   :  { %v469_v40 = vmul.f32 %v467_v38, %v464_v37 }
 0x797   :  { %v471_v41 = vadd.f32 %v470_v39, %v469_v40 }
 0x799   :  { %v1579_v42 = vpack.c.bf16 %v471_v41, %v471_v41 }
 0x79b   :  { %525 = vrot.lane.b32.xlu0 %v1579_v42, %s1431_s4 }
 0x80d   :  { %v526_v43 = vpop.permute.xlu0 %525 }
 0x80e   :  { %1309 = vmatmul.mubr.msk.bf16.vlgmr.msra.gmra.mxu0 %vm48_vm2, %v526_v43 }
 0x80f   :  { %1321 = vmatpush3.bf16.msra.mxu0 %v1479_v2  ;;  %1324 = vmatprep.mubr.msk.bf16.mxu0 %vm1428_vm0, %v1427_v1 }
 0x810   :  { %1322 = vmatprep.subr.bf16.mxu0 %v1427_v1 }
 0x813   :  { %1323 = vmatpush3.bf16.msra.mxu0 %v1491_v4 }
 0x814   :  { %1336 = vmatprep.subr.bf16.mxu0 %v1427_v1 }
 0x8ce   :  { %v564_v44 = vpop.f32.mrf.mxu0 }
 0x8cf   :  { %v565_v45 = vadd.f32 %v1522_v16, %v564_v44 }
 0x8d0   :  { %v1310_v46 = vpop.f32.mrf.mxu0 }
 0x8d1   :  { %v584_v48 = vrot.slane %v565_v45, %v1525_v18  ;;  %v570_v54 = vadd.f32 %v565_v45, %v524_v53 }
 0x8d2   :  { %v567_v49 = vpop.f32.mrf.mxu0 }
 0x8d3   :  { %585 = vrot.lane.b32.xlu1 %v584_v48, %s1430_s3  ;;  %v1227_v55 = vmul.f32 -1.442695, %v570_v54 }
 0x8d4   :  { %v1311_v50 = vpop.f32.mrf.mxu0 }
 0x8d5   :  { %1375 = vpow2.f32 %v1227_v55 }
 0x8e2   :  { %v1376_v56 = vpop.eup %1375 }
 0x8e3   :  { %v574_v57 = vadd.f32 1.0, %v1376_v56 }
 0x8e5   :  { %1377 = vrcp.f32 %v574_v57 }
 0x8f2   :  { %v1378_v58 = vpop.eup %1377 }
 0x8f3   :  { %v595_v0 = vsub.f32 1.0, %v1378_v58  ;;  %v601_v5 = vmul.f32 %v1378_v58, %v471_v41 }
 0x945   :  { %v586_v59 = vpop.permute.xlu1 %585 }
 0x946   :  { %v588_v60 = vmul.f32 %v1378_v58, %v586_v59 }
 0x948   :  { %590 = vrot.lane.b32.xlu0 %v588_v60, %s1430_s3 }
 0x9ba   :  { %v591_v61 = vpop.permute.xlu0 %590 }
 0x9bb   :  { %v593_v62 = vadd.f32 %v591_v61, %v524_v53 }
 0x9bd   :  { %1379 = vtanh.f32 %v593_v62 }
 0x9ca   :  { %v1380_v63 = vpop.eup %1379 }
 0x9cb   :  { %597 = vrot.lane.b32.xlu1 %v1380_v63, %s1431_s4 }
 0xa3d   :  { %v598_v3 = vpop.permute.xlu1 %597 }
 0xa3e   :  { %v600_v6 = vmul.f32 %v598_v3, %v595_v0 }
 0xa40   :  { %v602_v7 = vadd.f32 %v601_v5, %v600_v6 }
 0xa42   :  { %v1599_v8 = vpack.c.bf16 %v602_v7, %v602_v7 }
 0xa44   :  { %655 = vrot.lane.b32.xlu0 %v1599_v8, %s1431_s4 }
 0xab6   :  { %v656_v9 = vpop.permute.xlu0 %655 }
 0xab7   :  { %1317 = vmatmul.mubr.msk.bf16.vlgmr.msra.gmra.mxu1 %vm48_vm2, %v656_v9 }
 0xab8   :  { %1329 = vmatpush3.bf16.msra.mxu1 %v1479_v2  ;;  %1332 = vmatprep.mubr.msk.bf16.mxu1 %vm1428_vm0, %v1427_v1 }
 0xab9   :  { %1330 = vmatprep.subr.bf16.mxu1 %v1427_v1 }
 0xabc   :  { %1331 = vmatpush3.bf16.msra.mxu1 %v1491_v4 }
 0xb77   :  { %v694_v10 = vpop.f32.mrf.mxu1 }
 0xb78   :  { %v695_v11 = vadd.f32 %v1522_v16, %v694_v10 }
 0xb79   :  { %v1318_v13 = vpop.f32.mrf.mxu1 }
 0xb7a   :  { %v714_v15 = vrot.slane %v695_v11, %v1525_v18  ;;  %v700_v23 = vadd.f32 %v695_v11, %v654_v22  ;;  %v1237_v13 = vld [vmem:[%s1934_s0 + $0x6] sm:$0x1] }
 0xb7b   :  { %v697_v17 = vpop.f32.mrf.mxu1 }
 0xb7c   :  { %715 = vrot.lane.b32.xlu1 %v714_v15, %s1430_s3  ;;  %v1231_v24 = vmul.f32 -1.442695, %v700_v23  ;;  %v914_v15 = vunpack.c.l.bf16 %v1237_v13 }
 0xb7d   :  { %v1319_v19 = vpop.f32.mrf.mxu1 }
 0xb7e   :  { %1381 = vpow2.f32 %v1231_v24  ;;  %v915_v17 = vadd.f32 %v914_v15, %v1533_v28 }
 0xb8b   :  { %v1382_v25 = vpop.eup %1381 }
 0xb8c   :  { %v704_v26 = vadd.f32 1.0, %v1382_v25 }
 0xb8e   :  { %1383 = vrcp.f32 %v704_v26 }
 0xb9b   :  { %v1384_v27 = vpop.eup %1383 }
 0xb9c   :  { %v725_v34 = vsub.f32 1.0, %v1384_v27  ;;  %v731_v36 = vmul.f32 %v1384_v27, %v602_v7 }
 0xbee   :  { %v716_v29 = vpop.permute.xlu1 %715 }
 0xbef   :  { %v718_v30 = vmul.f32 %v1384_v27, %v716_v29 }
 0xbf1   :  { %720 = vrot.lane.b32.xlu0 %v718_v30, %s1430_s3 }
 0xc63   :  { %v721_v31 = vpop.permute.xlu0 %720 }
 0xc64   :  { %v723_v32 = vadd.f32 %v721_v31, %v654_v22 }
 0xc66   :  { %1385 = vtanh.f32 %v723_v32 }
 0xc73   :  { %v1386_v33 = vpop.eup %1385 }
 0xc74   :  { %727 = vrot.lane.b32.xlu1 %v1386_v33, %s1431_s4 }
 0xce6   :  { %v728_v35 = vpop.permute.xlu1 %727 }
 0xce7   :  { %v730_v37 = vmul.f32 %v728_v35, %v725_v34 }
 0xce9   :  { %v732_v38 = vadd.f32 %v731_v36, %v730_v37 }
 0xceb   :  { %v1618_v39 = vpack.c.bf16 %v732_v38, %v732_v38 }
 0xced   :  { %786 = vrot.lane.b32.xlu0 %v1618_v39, %s1431_s4 }
 0xd5f   :  { %v787_v40 = vpop.permute.xlu0 %786 }
 0xd60   :  { %1325 = vmatmul.mubr.msk.bf16.vlgmr.msra.gmra.mxu0 %vm48_vm2, %v787_v40 }
 0xd61   :  { %1337 = vmatpush3.bf16.msra.mxu0 %v1479_v2  ;;  %1340 = vmatprep.mubr.msk.bf16.mxu0 %vm1428_vm0, %v1427_v1  ;;  %v1233_v2 = vld [vmem:[%s1934_s0 + $0x5] sm:$0x1]  ;;  %vm382_vm0 = vsmask.f32 7938 }
 0xd62   :  { %1338 = vmatprep.subr.bf16.mxu0 %v1427_v1  ;;  %v784_v49 = vunpack.c.l.bf16 %v1233_v2 }
 0xd64   :  { %v785_v50 = vadd.f32 %v784_v49, %v1533_v28 }
 0xd65   :  { %1339 = vmatpush3.bf16.msra.mxu0 %v1491_v4 }
 0xe20   :  { %v825_v41 = vpop.f32.mrf.mxu0 }
 0xe21   :  { %v826_v43 = vadd.f32 %v1522_v16, %v825_v41 }
 0xe22   :  { %v1326_v44 = vpop.f32.mrf.mxu0 }
 0xe23   :  { %v845_v45 = vrot.slane %v826_v43, %v1525_v18  ;;  %v831_v1 = vadd.f32 %v826_v43, %v785_v50 }
 0xe24   :  { %v828_v46 = vpop.f32.mrf.mxu0 }
 0xe25   :  { %846 = vrot.lane.b32.xlu1 %v845_v45, %s1430_s3  ;;  %v1235_v51 = vmul.f32 -1.442695, %v831_v1  ;;  %v1241_v45 = vld [vmem:[%s1934_s0 + $0x7] sm:$0x1]  ;;  %v1433_v1 = vmov 1966171168  }
 0xe26   :  { %v1327_v48 = vpop.f32.mrf.mxu0  ;;  %v1045_v46 = vunpack.c.l.bf16 %v1241_v45  ;;  %v1037_v45 = vld [vmem:[%s1939_s5] sm:$0x8] }
 0xe27   :  { %1387 = vpow2.f32 %v1235_v51 }
 0xe28   :  { %v1046_v48 = vadd.f32 %v1045_v46, %v1533_v28 }
 0xe34   :  { %v1388_v4 = vpop.eup %1387 }
 0xe35   :  { %v835_v52 = vadd.f32 1.0, %v1388_v4 }
 0xe37   :  { %1389 = vrcp.f32 %v835_v52 }
 0xe44   :  { %v1390_v53 = vpop.eup %1389 }
 0xe45   :  { %v856_v59 = vsub.f32 1.0, %v1390_v53  ;;  %v862_v61 = vmul.f32 %v1390_v53, %v732_v38 }
 0xe97   :  { %v847_v54 = vpop.permute.xlu1 %846 }
 0xe98   :  { %v849_v55 = vmul.f32 %v1390_v53, %v847_v54  ;;  %v1434_v53 = vmov 286326784  }
 0xe99   :  { %v232_v54 = vunpack.c.l.s4 %v1434_v53 }
 0xe9a   :  { %851 = vrot.lane.b32.xlu0 %v849_v55, %s1430_s3 }
 0xf0c   :  { %v852_v56 = vpop.permute.xlu0 %851 }
 0xf0d   :  { %v854_v57 = vadd.f32 %v852_v56, %v785_v50  ;;  %v233_v56 = vunpack.c.0.s8 %v232_v54 }
 0xf0f   :  { %1391 = vtanh.f32 %v854_v57 }
 0xf1c   :  { %v1392_v58 = vpop.eup %1391 }
 0xf1d   :  { %858 = vrot.lane.b32.xlu1 %v1392_v58, %s1431_s4 }
 0xf8f   :  { %v859_v60 = vpop.permute.xlu1 %858 }
 0xf90   :  { %v861_v62 = vmul.f32 %v859_v60, %v856_v59  ;;  %v1677_v59 = vsub.s32 %v233_v56, %v1517_v14 }
 0xf92   :  { %v863_v63 = vadd.f32 %v862_v61, %v861_v62 }
 0xf94   :  { %v1637_v0 = vpack.c.bf16 %v863_v63, %v863_v63 }
 0xf96   :  { %916 = vrot.lane.b32.xlu0 %v1637_v0, %s1431_s4 }
0x1008   :  { %v917_v3 = vpop.permute.xlu0 %916 }
0x1009   :  { %1333 = vmatmul.mubr.msk.bf16.vlgmr.msra.gmra.mxu1 %vm48_vm2, %v917_v3 }
0x10c9   :  { %v955_v5 = vpop.f32.mrf.mxu1 }
0x10ca   :  { %v956_v6 = vadd.f32 %v1522_v16, %v955_v5 }
0x10cb   :  { %v1334_v7 = vpop.f32.mrf.mxu1 }
0x10cc   :  { %v975_v9 = vrot.slane %v956_v6, %v1525_v18  ;;  %v961_v19 = vadd.f32 %v956_v6, %v915_v17 }
0x10cd   :  { %v958_v10 = vpop.f32.mrf.mxu1 }
0x10ce   :  { %976 = vrot.lane.b32.xlu1 %v975_v9, %s1430_s3  ;;  %v1239_v20 = vmul.f32 -1.442695, %v961_v19 }
0x10cf   :  { %v1335_v11 = vpop.f32.mrf.mxu1 }
0x10d0   :  { %1393 = vpow2.f32 %v1239_v20 }
0x10dd   :  { %v1394_v21 = vpop.eup %1393 }
0x10de   :  { %v965_v22 = vadd.f32 1.0, %v1394_v21 }
0x10e0   :  { %1395 = vrcp.f32 %v965_v22 }
0x10ed   :  { %v1396_v23 = vpop.eup %1395 }
0x10ee   :  { %v986_v30 = vsub.f32 1.0, %v1396_v23  ;;  %v992_v32 = vmul.f32 %v1396_v23, %v863_v63 }
0x1140   :  { %v977_v24 = vpop.permute.xlu1 %976 }
0x1141   :  { %v979_v25 = vmul.f32 %v1396_v23, %v977_v24 }
0x1143   :  { %981 = vrot.lane.b32.xlu0 %v979_v25, %s1430_s3 }
0x11b5   :  { %v982_v26 = vpop.permute.xlu0 %981 }
0x11b6   :  { %v984_v27 = vadd.f32 %v982_v26, %v915_v17 }
0x11b8   :  { %1397 = vtanh.f32 %v984_v27  ;;  %v779_v27 = vld [vmem:[%s1939_s5 + $0x4] sm:$0x4] }
0x11c5   :  { %v1398_v29 = vpop.eup %1397 }
0x11c6   :  { %988 = vrot.lane.b32.xlu1 %v1398_v29, %s1431_s4  ;;  %v254_v29 = vld [vmem:[%s1939_s5] sm:$0x1] }
0x1238   :  { %v989_v31 = vpop.permute.xlu1 %988 }
0x1239   :  { %v991_v33 = vmul.f32 %v989_v31, %v986_v30 }
0x123b   :  { %v1651_v34 = vadd.f32 %v992_v32, %v991_v33  ;;  %v515_v33 = vld [vmem:[%s1939_s5] sm:$0x2] }
0x123d   :  { %v994_v35 = vpack.c.bf16 %v1651_v34, %v1651_v34 }
0x123f   :  { %1047 = vrot.lane.b32.xlu0 %v994_v35, %s1431_s4 }
0x12b1   :  { %v1048_v36 = vpop.permute.xlu0 %1047 }
0x12b2   :  { %1341 = vmatmul.mubr.msk.bf16.vlgmr.msra.gmra.mxu0 %vm48_vm2, %v1048_v36  ;;  %vm1792_vm2 = vmand %vm251_vm4, %vm382_vm0 }
0x12b3   :  { %vm1808_vm4 = vmand %vm512_vm7, %vm643_vm3 }
0x12b4   :  { %vm1824_vm7 = vmand %vm773_vm10, %vm904_vm5 }
0x1372   :  { %v1086_v37 = vpop.f32.mrf.mxu0 }
0x1373   :  { %v1087_v38 = vadd.f32 %v1522_v16, %v1086_v37  ;;  %v214_v16 = vunpack.c.l.s4 %v1433_v1 }
0x1374   :  { %v1342_v40 = vpop.f32.mrf.mxu0 }
0x1375   :  { %v1106_v41 = vrot.slane %v1087_v38, %v1525_v18  ;;  %v1092_v2 = vadd.f32 %v1087_v38, %v1046_v48  ;;  %v215_v4 = vunpack.c.0.s8 %v214_v16  ;;  %v776_v38 = vld [vmem:[%s1939_s5] sm:$0x4] }
0x1376   :  { %v1089_v43 = vpop.f32.mrf.mxu0 }
0x1377   :  { %1107 = vrot.lane.b32.xlu1 %v1106_v41, %s1430_s3  ;;  %v1243_v49 = vmul.f32 -1.442695, %v1092_v2  ;;  %v1665_v52 = vsub.s32 %v215_v4, %v1517_v14 }
0x1378   :  { %v1343_v44 = vpop.f32.mrf.mxu0 }
0x1379   :  { %1399 = vpow2.f32 %v1243_v49  ;;  %v219_v55 = vrot.slane %v1539_v47, %v1665_v52  ;;  %v480_v28 = vrot.slane %v1579_v42, %v1665_v52  ;;  %v741_v61 = vrot.slane %v1618_v39, %v1665_v52 }
0x137a   :  { %v1002_v42 = vrot.slane %v994_v35, %v1665_v52  ;;  %v350_v39 = vrot.slane %v1559_v12, %v1665_v52  ;;  %v611_v10 = vrot.slane %v1599_v8, %v1665_v52  ;;  %v872_v15 = vrot.slane %v1637_v0, %v1665_v52 }
0x137b   :  { %v1672_v57 = vrot.slane %v219_v55, %v1665_v52  ;;  %v1685_v63 = vrot.slane %v480_v28, %v1665_v52  ;;  %v1693_v5 = vrot.slane %v741_v61, %v1665_v52 }
0x137c   :  { %v1702_v9 = vrot.slane %v1002_v42, %v1665_v52  ;;  %v1711_v12 = vrot.slane %v350_v39, %v1665_v52  ;;  %v1720_v8 = vrot.slane %v611_v10, %v1665_v52  ;;  %v1727_v22 = vrot.slane %v872_v15, %v1665_v52 }
0x137d   :  { %v1216_v47 = vpack.i.b16 %v1672_v57, %v1672_v57  ;;  %v1224_v14 = vpack.i.b16 %v1685_v63, %v1685_v63  ;;  %v1232_v7 = vpack.i.b16 %v1693_v5, %v1693_v5  ;;  %v228_v40 = vunpack.i.h.s16 %v1672_v57 }
0x137e   :  { %v1240_v13 = vpack.i.b16 %v1702_v9, %v1702_v9  ;;  %v1220_v19 = vpack.i.b16 %v1711_v12, %v1711_v12  ;;  %v1228_v21 = vpack.i.b16 %v1720_v8, %v1720_v8  ;;  %v1236_v23 = vpack.i.b16 %v1727_v22, %v1727_v22 }
0x137f   :  { %v237_v3 = vrot.slane %v1216_v47, %v1677_v59  ;;  %v498_v6 = vrot.slane %v1224_v14, %v1677_v59  ;;  %v759_v11 = vrot.slane %v1232_v7, %v1677_v59  ;;  %v230_v46 = vpack.i.b16 %v228_v40, %v228_v40 }
0x1380   :  { %v1020_v17 = vrot.slane %v1240_v13, %v1677_v59  ;;  %v368_v20 = vrot.slane %v1220_v19, %v1677_v59  ;;  %v629_v0 = vrot.slane %v1228_v21, %v1677_v59  ;;  %v890_v24 = vrot.slane %v1236_v23, %v1677_v59 }
0x1381   :  { %v244_v16 = vrot.slane %v230_v46, %v1677_v59  ;;  %v750_v4 = vunpack.i.h.s16 %v1693_v5  ;;  %v359_v14 = vunpack.i.h.s16 %v1711_v12  ;;  %v620_v10 = vunpack.i.h.s16 %v1720_v8 }
0x1382   :  { %v881_v12 = vunpack.i.h.s16 %v1727_v22  ;;  %v257_v22 = vld [vmem:[%s1939_s5 + $0x4] sm:$0x1] }
0x1383   :  { %v752_v57 = vpack.i.b16 %v750_v4, %v750_v4  ;;  %v622_v13 = vpack.i.b16 %v620_v10, %v620_v10 }
0x1385   :  { %v766_v42 = vrot.slane %v752_v57, %v1677_v59  ;;  %v636_v15 = vrot.slane %v622_v13, %v1677_v59 }
0x1386   :  { %v1400_v50 = vpop.eup %1399 }
0x1387   :  { %v1096_v51 = vadd.f32 1.0, %v1400_v50 }
0x1389   :  { %1401 = vrcp.f32 %v1096_v51 }
0x1396   :  { %v1674_v58 = vpop.eup %1401 }
0x1397   :  { %v1117_v8 = vsub.f32 1.0, %v1674_v58  ;;  %v1123_v21 = vmul.f32 %v1674_v58, %v1651_v34 }
0x13e9   :  { %v1108_v60 = vpop.permute.xlu1 %1107 }
0x13ea   :  { %v1110_v62 = vmul.f32 %v1674_v58, %v1108_v60  ;;  %v1011_v60 = vunpack.i.h.s16 %v1702_v9  ;;  %v361_v9 = vpack.i.b16 %v359_v14, %v359_v14 }
0x13ec   :  { %1112 = vrot.lane.b32.xlu0 %v1110_v62, %s1430_s3 }
0x13f0   :  { %245 = vrot.lane.b32.xlu0 %v237_v3, %s1431_s4  ;;  %v1013_v3 = vpack.i.b16 %v1011_v60, %v1011_v60 }
0x13f2   :  { %v1027_v7 = vrot.slane %v1013_v3, %v1677_v59 }
0x13f4   :  { %506 = vrot.lane.b32.xlu0 %v498_v6, %s1431_s4 }
0x13f8   :  { %767 = vrot.lane.b32.xlu0 %v759_v11, %s1431_s4  ;;  %v375_v11 = vrot.slane %v361_v9, %v1677_v59 }
0x13fc   :  { %1028 = vrot.lane.b32.xlu0 %v1020_v17, %s1431_s4  ;;  %v883_v17 = vpack.i.b16 %v881_v12, %v881_v12 }
0x13fe   :  { %v897_v19 = vrot.slane %v883_v17, %v1677_v59 }
0x1400   :  { %376 = vrot.lane.b32.xlu0 %v368_v20, %s1431_s4 }
0x1404   :  { %637 = vrot.lane.b32.xlu0 %v629_v0, %s1431_s4 }
0x1408   :  { %898 = vrot.lane.b32.xlu0 %v890_v24, %s1431_s4 }
0x145e   :  { %v1113_v25 = vpop.permute.xlu0 %1112 }
0x145f   :  { %v1115_v26 = vadd.f32 %v1113_v25, %v1046_v48  ;;  %v489_v48 = vunpack.i.h.s16 %v1685_v63 }
0x1461   :  { %1403 = vtanh.f32 %v1115_v26  ;;  %v491_v51 = vpack.i.b16 %v489_v48, %v489_v48 }
0x1462   :  { %v246_v30 = vpop.permute.xlu0 %245 }
0x1463   :  { %v255_v31 = vsel %vm1737_vm6, %v246_v30, %v254_v29  ;;  %v505_v28 = vrot.slane %v491_v51, %v1677_v59  ;;  %v518_v29 = vld [vmem:[%s1939_s5 + $0x4] sm:$0x2] }
0x1464   :  { %256 = vst [vmem:[%s1939_s5] sm:$0x1] %v255_v31 }
0x1466   :  { %v507_v35 = vpop.permute.xlu0 %506 }
0x1467   :  { %v516_v36 = vsel %vm1750_vm9, %v507_v35, %v515_v33 }
0x1468   :  { %517 = vst [vmem:[%s1939_s5] sm:$0x2] %v516_v36 }
0x146a   :  { %v768_v41 = vpop.permute.xlu0 %767 }
0x146b   :  { %v777_v43 = vsel %vm1763_vm12, %v768_v41, %v776_v38  ;;  %v384_v53 = vld [vmem:[%s1939_s5] sm:$0x1] }
0x146c   :  { %778 = vst [vmem:[%s1939_s5] sm:$0x4] %v777_v43 }
0x146e   :  { %v1404_v2 = vpop.eup %1403  ;;  %v1029_v49 = vpop.permute.xlu0 %1028 }
0x146f   :  { %v1038_v50 = vsel %vm1777_vm15, %v1029_v49, %v1037_v45  ;;  %1119 = vrot.lane.b32.xlu1 %v1404_v2, %s1431_s4  ;;  %v645_v61 = vld [vmem:[%s1939_s5] sm:$0x2] }
0x1470   :  { %1039 = vst [vmem:[%s1939_s5] sm:$0x8] %v1038_v50 }
0x1472   :  { %v377_v54 = vpop.permute.xlu0 %376 }
0x1473   :  { %v385_v55 = vsel %vm1792_vm2, %v377_v54, %v384_v53  ;;  %247 = vrot.lane.b32.xlu1 %v244_v16, %s1431_s4  ;;  %v906_v5 = vld [vmem:[%s1939_s5] sm:$0x4] }
0x1474   :  { %386 = vst [vmem:[%s1939_s5] sm:$0x1] %v385_v55 }
0x1476   :  { %v638_v62 = vpop.permute.xlu0 %637 }
0x1477   :  { %v646_v47 = vsel %vm1808_vm4, %v638_v62, %v645_v61  ;;  %508 = vrot.lane.b32.xlu1 %v505_v28, %s1431_s4  ;;  %v1167_v16 = vld [vmem:[%s1939_s5] sm:$0x8] }
0x1478   :  { %647 = vst [vmem:[%s1939_s5] sm:$0x2] %v646_v47 }
0x147a   :  { %v899_v39 = vpop.permute.xlu0 %898 }
0x147b   :  { %v907_v6 = vsel %vm1824_vm7, %v899_v39, %v906_v5  ;;  %769 = vrot.lane.b32.xlu1 %v766_v42, %s1431_s4 }
0x147c   :  { %908 = vst [vmem:[%s1939_s5] sm:$0x4] %v907_v6 }
0x147f   :  { %1030 = vrot.lane.b32.xlu1 %v1027_v7, %s1431_s4 }
0x1483   :  { %378 = vrot.lane.b32.xlu1 %v375_v11, %s1431_s4 }
0x1487   :  { %639 = vrot.lane.b32.xlu1 %v636_v15, %s1431_s4 }
0x148b   :  { %900 = vrot.lane.b32.xlu1 %v897_v19, %s1431_s4 }
0x14e1   :  { %v1120_v20 = vpop.permute.xlu1 %1119 }
0x14e2   :  { %v1122_v0 = vmul.f32 %v1120_v20, %v1117_v8 }
0x14e4   :  { %v1124_v23 = vadd.f32 %v1123_v21, %v1122_v0 }
0x14e5   :  { %v248_v24 = vpop.permute.xlu1 %247 }
0x14e6   :  { %v1125_v25 = vpack.c.bf16 %v1124_v23, %v1124_v23  ;;  %v258_v26 = vsel %vm1737_vm6, %v248_v24, %v257_v22  ;;  %v1180_v45 = vrot.slane %v1124_v23, %v1525_v18  ;;  %vm1165_vm6 = vsmask.f32 7950 }
0x14e7   :  { %259 = vst [vmem:[%s1939_s5 + $0x4] sm:$0x1] %v258_v26  ;;  %vm1166_vm8 = vmand %vm1034_vm13, %vm1165_vm6 }
0x14e8   :  { %v1133_v34 = vrot.slane %v1125_v25, %v1665_v52 }
0x14e9   :  { %v509_v58 = vpop.permute.xlu1 %508 }
0x14ea   :  { %v519_v30 = vsel %vm1750_vm9, %v509_v58, %v518_v29  ;;  %v1140_v31 = vrot.slane %v1133_v34, %v1665_v52  ;;  %v1040_v52 = vld [vmem:[%s1939_s5 + $0x4] sm:$0x8] }
0x14eb   :  { %520 = vst [vmem:[%s1939_s5 + $0x4] sm:$0x2] %v519_v30 }
0x14ec   :  { %v1244_v33 = vpack.i.b16 %v1140_v31, %v1140_v31  ;;  %v1142_v35 = vunpack.i.h.s16 %v1140_v31 }
0x14ed   :  { %v770_v36 = vpop.permute.xlu1 %769 }
0x14ee   :  { %v780_v38 = vsel %vm1763_vm12, %v770_v36, %v779_v27  ;;  %v1151_v40 = vrot.slane %v1244_v33, %v1677_v59  ;;  %v1144_v32 = vpack.i.b16 %v1142_v35, %v1142_v35  ;;  %v387_v46 = vld [vmem:[%s1939_s5 + $0x4] sm:$0x1] }
0x14ef   :  { %781 = vst [vmem:[%s1939_s5 + $0x4] sm:$0x4] %v780_v38 }
0x14f0   :  { %1159 = vrot.lane.b32.xlu0 %v1151_v40, %s1431_s4  ;;  %v1158_v41 = vrot.slane %v1144_v32, %v1677_v59 }
0x14f1   :  { %v1031_v43 = vpop.permute.xlu1 %1030 }
0x14f2   :  { %v1041_v37 = vsel %vm1777_vm15, %v1031_v43, %v1040_v52  ;;  %1161 = vrot.lane.b32.xlu1 %v1158_v41, %s1431_s4  ;;  %v648_v18 = vld [vmem:[%s1939_s5 + $0x4] sm:$0x2] }
0x14f3   :  { %1042 = vst [vmem:[%s1939_s5 + $0x4] sm:$0x8] %v1041_v37 }
0x14f4   :  { %1181 = vrot.lane.b32.xlu0 %v1180_v45, %s1431_s4 }
0x14f5   :  { %v379_v48 = vpop.permute.xlu1 %378 }
0x14f6   :  { %v388_v59 = vsel %vm1792_vm2, %v379_v48, %v387_v46  ;;  %v909_v49 = vld [vmem:[%s1939_s5 + $0x4] sm:$0x4] }
0x14f7   :  { %389 = vst [vmem:[%s1939_s5 + $0x4] sm:$0x1] %v388_v59 }
0x14f9   :  { %v640_v44 = vpop.permute.xlu1 %639 }
0x14fa   :  { %v649_v2 = vsel %vm1808_vm4, %v640_v44, %v648_v18  ;;  %v1170_v53 = vld [vmem:[%s1939_s5 + $0x4] sm:$0x8] }
0x14fb   :  { %650 = vst [vmem:[%s1939_s5 + $0x4] sm:$0x2] %v649_v2 }
0x14fd   :  { %v901_v50 = vpop.permute.xlu1 %900 }
0x14fe   :  { %v910_v1 = vsel %vm1824_vm7, %v901_v50, %v909_v49 }
0x14ff   :  { %911 = vst [vmem:[%s1939_s5 + $0x4] sm:$0x4] %v910_v1 }
0x1562   :  { %v1160_v51 = vpop.permute.xlu0 %1159 }
0x1563   :  { %v1168_v4 = vsel %vm1166_vm8, %v1160_v51, %v1167_v16 }
0x1564   :  { %1169 = vst [vmem:[%s1939_s5] sm:$0x8] %v1168_v4  ;;  %v1162_v54 = vpop.permute.xlu1 %1161 }
0x1565   :  { %v1171_v55 = vsel %vm1166_vm8, %v1162_v54, %v1170_v53 }
0x1566   :  { %1172 = vst [vmem:[%s1939_s5 + $0x4] sm:$0x8] %v1171_v55  ;;  %v1182_v56 = vpop.permute.xlu0 %1181 }
0x1567   :  { %1185 = vst.msk [vmem:[#allocation2] sm:$0x3] %vm29_vm1, %v1182_v56  ;;  %1189 = vst.msk [vmem:[#allocation4] sm:$0x3] %vm29_vm1, %v1182_v56 }
0x1568   :  { %1416 = shalt.err (!%p1413_p4)
}
0x1569   :  { %1201 = dma.vmem_to_hbm [thread:$0]  %s1199_s25, 32, %s1940_s6, [#allocation5]  }
0x156a   :  { %1425 = dma.done.wait [#allocation5], 32  }
0x156b   :  { %1426 = vsyncadd [#allocation5], 4294967264 }
0x156c   :  { %1207 = vsyncpa [#allocation5], 1 }

</bundles_post_ra>
